<compile_context>
chip_gen: v7x
topology: tpu7x:2x2x1
jax: 0.10.0
libtpu: 0.0.40
codegen_flags: <defaults>
</compile_context>

<pallas_src>
import functools
import math

import jax
import jax.numpy as jnp
from jax.experimental import pallas as pl
from jax.experimental.pallas import tpu as pltpu

_INV_SQRT2 = 1.0 / math.sqrt(2.0)


def _round_up(n, m):
    return -(-n // m) * m


def _imgnn_kernel(x_ref, w1_ref, b1_ref, w2_ref, b2_ref, o_ref, *, approximate_gelu):
    # x_ref:  (TB, D_in)   (bf16)
    # w1_ref: (D_in, MID)  (bf16), b1_ref: (1, MID)  (f32)
    # w2_ref: (MID, D_out) (bf16), b2_ref: (1, D_out)(f32)
    # o_ref:  (TB, D_out)  (f32)
    x = x_ref[...]
    # MXU matmul with f32 accumulation; bias add in f32.
    h = jnp.dot(x, w1_ref[...], preferred_element_type=jnp.float32) + b1_ref[...]
    if approximate_gelu:
        # tanh-approx GELU runs on the EUP slot (overlaps MXU work for free).
        h = jax.nn.gelu(h, approximate=True)
    else:
        # exact erf-GELU to match the PyTorch module's numerics.
        h = h * 0.5 * (1.0 + jax.lax.erf(h * _INV_SQRT2))
    out = jnp.dot(h.astype(w2_ref.dtype), w2_ref[...],
                  preferred_element_type=jnp.float32) + b2_ref[...]
    o_ref[...] = out.astype(o_ref.dtype)


def prepare_params(w1, b1, w2, b2, *, mxu_dtype=jnp.bfloat16):
    """One-time weight prep: transpose-free (already (in, out)), bf16 weights,
    f32 row-vector biases.  Do this once, not per forward call."""
    return (
        w1.astype(mxu_dtype),
        b1.reshape(1, -1).astype(jnp.float32),
        w2.astype(mxu_dtype),
        b2.reshape(1, -1).astype(jnp.float32),
    )


def imgnn_forward(x, params, *, tile_b=256, approximate_gelu=False):
    """x: (B, D_in).  params: output of prepare_params (W's are (in, out))."""
    w1, b1, w2, b2 = params
    B, D_in = x.shape
    MID = w1.shape[1]
    D_out = w2.shape[1]
    mxu_dtype = w1.dtype

    # Clamp the batch tile for small batches, otherwise use the big MXU-filling
    # tile; pad B up to a tile multiple so any batch size takes the fast path.
    tb = min(tile_b, _round_up(max(B, 1), 8))
    B_pad = _round_up(B, tb)

    x = x.astype(mxu_dtype)
    if B_pad != B:
        x = jnp.pad(x, ((0, B_pad - B), (0, 0)))

    grid = (B_pad // tb,)

    # VMEM budget: double-buffered x/out tiles, grid-resident weights (still 2x
    # buffered by default), f32 intermediates; cap at 64 MiB (v7x physical).
    e = jnp.dtype(mxu_dtype).itemsize
    est = (2 * tb * D_in * e
           + 2 * tb * D_out * 4
           + 2 * (D_in * MID + MID * D_out) * e
           + 2 * (MID + D_out) * 4
           + tb * (MID + D_out) * 4)
    vmem_limit = int(min(max(2 * est, 32 * 1024 * 1024), 64 * 1024 * 1024))

    kernel = functools.partial(_imgnn_kernel, approximate_gelu=approximate_gelu)

    out = pl.pallas_call(
        kernel,
        out_shape=jax.ShapeDtypeStruct((B_pad, D_out), jnp.float32),
        grid=grid,
        in_specs=[
            pl.BlockSpec((tb, D_in), lambda i: (i, 0)),     # x tile (bf16)
            pl.BlockSpec((D_in, MID), lambda i: (0, 0)),    # W1 resident (bf16)
            pl.BlockSpec((1, MID), lambda i: (0, 0)),       # b1 (f32)
            pl.BlockSpec((MID, D_out), lambda i: (0, 0)),   # W2 resident (bf16)
            pl.BlockSpec((1, D_out), lambda i: (0, 0)),     # b2 (f32)
        ],
        out_specs=pl.BlockSpec((tb, D_out), lambda i: (i, 0)),  # lane-dense (>=128)
        compiler_params=pltpu.CompilerParams(
            dimension_semantics=("parallel",),   # batch axis shards across v7x TCs
            vmem_limit_bytes=vmem_limit,
        ),
    )(x, w1, b1, w2, b2)

    return out[:B] if B_pad != B else out


def _ref_forward_bf16(x, w1, b1, w2, b2):
    """Emulates the kernel's bf16-input / f32-accumulation math."""
    h = jnp.dot(x.astype(jnp.bfloat16), w1.astype(jnp.bfloat16),
                preferred_element_type=jnp.float32) + b1
    h = h * 0.5 * (1.0 + jax.lax.erf(h * _INV_SQRT2))
    return jnp.dot(h.astype(jnp.bfloat16), w2.astype(jnp.bfloat16),
                   preferred_element_type=jnp.float32) + b2


def _ref_forward_f32(x, w1, b1, w2, b2):
    h = jnp.dot(x, w1, precision=jax.lax.Precision.HIGHEST) + b1
    h = h * 0.5 * (1.0 + jax.lax.erf(h * _INV_SQRT2))
    return jnp.dot(h, w2, precision=jax.lax.Precision.HIGHEST) + b2


if __name__ == "__main__":
    # Scaled-down version of the module's (input_dim -> mid -> out) MLP, sized so
    # the grid is non-degenerate (2 steps of 256 rows) and lanes stay 128-aligned.
    B, D_IN, MID, D_OUT = 512, 512, 256, 128

    key = jax.random.PRNGKey(0)
    kx, kw1, kb1, kw2, kb2 = jax.random.split(key, 5)

    x = jax.random.normal(kx, (B, D_IN), dtype=jnp.float32)

    # PyTorch-Linear-style init (uniform +/- 1/sqrt(fan_in)), stored already
    # transposed to (in_features, out_features).
    lim1 = 1.0 / math.sqrt(D_IN)
    lim2 = 1.0 / math.sqrt(MID)
    w1 = jax.random.uniform(kw1, (D_IN, MID), minval=-lim1, maxval=lim1, dtype=jnp.float32)
    b1 = jax.random.uniform(kb1, (MID,), minval=-lim1, maxval=lim1, dtype=jnp.float32)
    w2 = jax.random.uniform(kw2, (MID, D_OUT), minval=-lim2, maxval=lim2, dtype=jnp.float32)
    b2 = jax.random.uniform(kb2, (D_OUT,), minval=-lim2, maxval=lim2, dtype=jnp.float32)

    params = prepare_params(w1, b1, w2, b2)

    # Main path: B=512, tile_b=256 -> grid of 2 "parallel" steps.
    out = jax.block_until_ready(imgnn_forward(x, params, tile_b=256))
    assert out.shape == (B, D_OUT)

    ref_bf16 = _ref_forward_bf16(x, w1, b1, w2, b2)
    ref_f32 = _ref_forward_f32(x, w1, b1, w2, b2)
    assert jnp.allclose(out, ref_bf16, atol=2e-3, rtol=2e-3)   # same bf16/f32-acc math
    assert jnp.allclose(out, ref_f32, atol=5e-2, rtol=5e-2)    # close to full-f32 ref

    # Ragged-batch path: B=300 pads to 512 internally and is sliced back.
    x_small = x[:300]
    out_small = jax.block_until_ready(imgnn_forward(x_small, params, tile_b=256))
    assert out_small.shape == (300, D_OUT)
    assert jnp.allclose(out_small, ref_bf16[:300], atol=2e-3, rtol=2e-3)

    print("KERNEL_OK")
</pallas_src>

<mosaic_0001>
module attributes {stable_mosaic.version = 11 : i64} {
  func.func @_imgnn_kernel(%arg0: i32, %arg1: memref<256x512xbf16, #tpu.memory_space<vmem>>, %arg2: memref<512x256xbf16, #tpu.memory_space<vmem>>, %arg3: memref<1x256xf32, #tpu.memory_space<vmem>>, %arg4: memref<256x128xbf16, #tpu.memory_space<vmem>>, %arg5: memref<1x128xf32, #tpu.memory_space<vmem>>, %arg6: memref<256x128xf32, #tpu.memory_space<vmem>>) attributes {dimension_semantics = [#tpu.dimension_semantics<parallel>], iteration_bounds = array<i64: 2>, scalar_prefetch = 0 : i64, scratch_operands = 0 : i64, tpu.core_type = #tpu.core_type<tc>, window_params = [{transform_indices = @transform_0, window_bounds = array<i64: 256, 512>}, {pipeline_mode = #tpu.pipeline_mode<synchronous>, transform_indices = @transform_1, window_bounds = array<i64: 512, 256>}, {pipeline_mode = #tpu.pipeline_mode<synchronous>, transform_indices = @transform_2, window_bounds = array<i64: 1, 256>}, {pipeline_mode = #tpu.pipeline_mode<synchronous>, transform_indices = @transform_3, window_bounds = array<i64: 256, 128>}, {pipeline_mode = #tpu.pipeline_mode<synchronous>, transform_indices = @transform_4, window_bounds = array<i64: 1, 128>}, {transform_indices = @transform_5, window_bounds = array<i64: 256, 128>}]} {
    %c0 = arith.constant 0 : index
    %c0_0 = arith.constant 0 : index
    %0 = vector.load %arg1[%c0, %c0_0] : memref<256x512xbf16, #tpu.memory_space<vmem>>, vector<256x512xbf16>
    %c0_1 = arith.constant 0 : index
    %c0_2 = arith.constant 0 : index
    %1 = vector.load %arg2[%c0_1, %c0_2] : memref<512x256xbf16, #tpu.memory_space<vmem>>, vector<512x256xbf16>
    %cst = arith.constant dense<0.000000e+00> : vector<256x256xf32>
    %2 = tpu.matmul %0, %1, %cst {dimension_numbers = #tpu.dot_dimension_numbers<[1], [0], [0], [1], [0, 0, 1, 1], [], []>} : vector<256x512xbf16>, vector<512x256xbf16>, vector<256x256xf32> -> vector<256x256xf32>
    %c0_3 = arith.constant 0 : index
    %c0_4 = arith.constant 0 : index
    %3 = vector.load %arg3[%c0_3, %c0_4] : memref<1x256xf32, #tpu.memory_space<vmem>>, vector<1x256xf32>
    %4 = vector.broadcast %3 : vector<1x256xf32> to vector<256x256xf32>
    %5 = arith.addf %2, %4 : vector<256x256xf32>
    %cst_5 = arith.constant 5.000000e-01 : f32
    %6 = vector.broadcast %cst_5 : f32 to vector<256x256xf32>
    %7 = arith.mulf %5, %6 : vector<256x256xf32>
    %cst_6 = arith.constant 0.707106769 : f32
    %8 = vector.broadcast %cst_6 : f32 to vector<256x256xf32>
    %9 = arith.mulf %5, %8 : vector<256x256xf32>
    %10 = math.erf %9 : vector<256x256xf32>
    %cst_7 = arith.constant 1.000000e+00 : f32
    %11 = vector.broadcast %cst_7 : f32 to vector<256x256xf32>
    %12 = arith.addf %11, %10 : vector<256x256xf32>
    %13 = arith.mulf %7, %12 : vector<256x256xf32>
    %14 = arith.truncf %13 : vector<256x256xf32> to vector<256x256xbf16>
    %c0_8 = arith.constant 0 : index
    %c0_9 = arith.constant 0 : index
    %15 = vector.load %arg4[%c0_8, %c0_9] : memref<256x128xbf16, #tpu.memory_space<vmem>>, vector<256x128xbf16>
    %cst_10 = arith.constant dense<0.000000e+00> : vector<256x128xf32>
    %16 = tpu.matmul %14, %15, %cst_10 {dimension_numbers = #tpu.dot_dimension_numbers<[1], [0], [0], [1], [0, 0, 1, 1], [], []>} : vector<256x256xbf16>, vector<256x128xbf16>, vector<256x128xf32> -> vector<256x128xf32>
    %c0_11 = arith.constant 0 : index
    %c0_12 = arith.constant 0 : index
    %17 = vector.load %arg5[%c0_11, %c0_12] : memref<1x128xf32, #tpu.memory_space<vmem>>, vector<1x128xf32>
    %18 = vector.broadcast %17 : vector<1x128xf32> to vector<256x128xf32>
    %19 = arith.addf %16, %18 : vector<256x128xf32>
    %c0_13 = arith.constant 0 : index
    %c0_14 = arith.constant 0 : index
    %20 = vector.load %arg6[%c0_13, %c0_14] : memref<256x128xf32, #tpu.memory_space<vmem>>, vector<256x128xf32>
    tpu.vector_store %arg6[%c0_13, %c0_14], %19 {strides = array<i32>} : memref<256x128xf32, #tpu.memory_space<vmem>>, vector<256x128xf32>,
    return
  }
  func.func @transform_0(%arg0: i32) -> (i32, i32) {
    %c0_i32 = arith.constant 0 : i32
    %c0_i32_0 = arith.constant 0 : i32
    return %arg0, %c0_i32 : i32, i32
  }
  func.func @transform_1(%arg0: i32) -> (i32, i32) {
    %c0_i32 = arith.constant 0 : i32
    %c0_i32_0 = arith.constant 0 : i32
    %c0_i32_1 = arith.constant 0 : i32
    return %c0_i32, %c0_i32_0 : i32, i32
  }
  func.func @transform_2(%arg0: i32) -> (i32, i32) {
    %c0_i32 = arith.constant 0 : i32
    %c0_i32_0 = arith.constant 0 : i32
    %c0_i32_1 = arith.constant 0 : i32
    return %c0_i32, %c0_i32_0 : i32, i32
  }
  func.func @transform_3(%arg0: i32) -> (i32, i32) {
    %c0_i32 = arith.constant 0 : i32
    %c0_i32_0 = arith.constant 0 : i32
    %c0_i32_1 = arith.constant 0 : i32
    return %c0_i32, %c0_i32_0 : i32, i32
  }
  func.func @transform_4(%arg0: i32) -> (i32, i32) {
    %c0_i32 = arith.constant 0 : i32
    %c0_i32_0 = arith.constant 0 : i32
    %c0_i32_1 = arith.constant 0 : i32
    return %c0_i32, %c0_i32_0 : i32, i32
  }
  func.func @transform_5(%arg0: i32) -> (i32, i32) {
    %c0_i32 = arith.constant 0 : i32
    %c0_i32_0 = arith.constant 0 : i32
    return %arg0, %c0_i32 : i32, i32
  }
}

</mosaic_0001>

<bundles_post_ra>
// kernel: tpu_custom_call.1
= control target key start
LH: loop header
LB: loop body
LE: loop exit
PB: predicated region body
PF: predicated region fallthrough
CT: control target
= control target key end

     0   :  { %10 = vsyncpa [#allocation3], 0  ;;  %s4002_s0 = inlined_call_operand.hbm [shape: bf16[512,512], index: 0, kind: input, shape index: {}]   ;;  %s4003_s1 = inlined_call_operand.hbm [shape: bf16[512,256], index: 1, kind: input, shape index: {}]   ;;  %s4004_s2 = inlined_call_operand.vmem [shape: f32[1,256], index: 2, kind: input, shape index: {}]   ;;  %s4005_s3 = inlined_call_operand.hbm [shape: bf16[256,128], index: 3, kind: input, shape index: {}]   ;;  %s4006_s4 = inlined_call_operand.vmem [shape: f32[1,128], index: 4, kind: input, shape index: {}]   ;;  %s4007_s5 = inlined_call_operand.hbm [shape: f32[512,128], index: 5, kind: output, shape index: {}]  }
   0x1   :  { %12 = vsyncpa [#allocation3 + $0x1], 0 }
   0x2   :  { %13 = vsyncpa [#allocation6], 0 }
   0x3   :  { %14 = vsyncpa [#allocation4], 0 }
   0x4   :  { %16 = vsyncpa [#allocation4 + $0x1], 0  ;;  %s3278_s18 = smov 0   ;;  %s3280_s19 = smov 0  }
   0x5   :  { %s3282_s20 = smov 0   ;;  %s3284_s21 = smov 0  }
   0x6 LB: > { %s3299_s22 = sadd.s32 4294967295, %s3234_s21   ;;  %s2228_s23 = sadd.s32 4294967294, %s3234_s21   ;;  %s3234_s21 = sphi %s3284_s21, %s4029_s21   ;;  %s3230_s20 = sphi %s3282_s20, %s4028_s20   ;;  %s3226_s19 = sphi %s3280_s19, %s4027_s19   ;;  %s3222_s18 = sphi %s3278_s18, %s4026_s18  }
   0x7   : > { %p42_p0 = scmp.ne.s32.totalorder %s3226_s19, %s3222_s18  ;;  %p4008_p1 = scmp.eq.s32.totalorder %s3299_s22, 0 }
   0x8   : > { %p156_p3 = scmp.eq.s32.totalorder %s2228_s23, 1  ;;  %p2229_p5 = scmp.ge.s32.totalorder %s3234_s21, 1 }
   0x9   : > { %p3308_p4 = por %p4008_p1, %p42_p0  ;;  %p163_p7 = scmp.lt.s32.totalorder %s3234_s21, 3 }
   0xa   : > { %p3313_p6 = por %p156_p3, %p42_p0  ;;  %s3236_s27 = smov [#allocation5]  }
   0xb   : > { %s4011_s24 = scalar_select %p3308_p4, 1, 0 }
   0xc   : > { %s4012_s25 = scalar_select %p3313_p6, 1, 0 }
   0xd   : > { %p3318_p8 = pnand %p2229_p5, %p163_p7  ;;  %s175_s28 = sshll.u32 %s3236_s27, 4  ;;  %s3322_s28 = int_to_ptr.vmem [resolvable:$true] %s175_s28 }
   0xe   : > { %s3237_s30 = smov [#allocation7]   ;;  %s3078_s9 = scalar_lea.hbm %s4003_s1, 8192 }
   0xf   : > { %p2679_p9 = pneg %p3318_p8  ;;  %s191_s6 = sshll.u32 %s3237_s30, 4  ;;  %s3333_s6 = int_to_ptr.vmem [resolvable:$true] %s191_s6 }
  0x10   : > { %p3079_p12 = scmp.ne.s32.totalorder %s4003_s1, %s3078_s9  ;;  %p3085_p5 = scmp.lt.u32.totalorder %s3078_s9, %s4003_s1 }
  0x11   : > { %p3329_p11 = pnand %p2679_p9, %p4008_p1 }
  0x13   : > { %p3080_p13 = pneg %p3329_p11 }
  0x15   : > { %p3081_p0 = pnand %p3080_p13, %p3079_p12 }
  0x17   : > { %p3082_p3 = pneg %p3081_p0 }
  0x19   : > { %p3087_p7 = pnand %p3085_p5, %p3082_p3 }
  0x1b   : > { %3090 = shalt.err (!%p3087_p7)
}
  0x1c   : > { %s3091_s14 = scalar_lea.vmem %s3322_s28, 8192  ;;  %p3099_p2 = scmp.lt.s32.totalorder %s3322_s28, %s3322_s28 }
  0x1d   : > { %p3092_p9 = scmp.ne.s32.totalorder %s3322_s28, %s3091_s14  ;;  %p3100_p12 = scmp.lt.s32.totalorder %s3091_s14, %s3091_s14 }
  0x1f   : > { %p3094_p10 = pnand %p3092_p9, %p3080_p13  ;;  %p3101_p0 = por %p3100_p12, %p3099_p2 }
  0x21   : > { %p3095_p1 = pneg %p3094_p10 }
  0x23   : > { %p3102_p6 = pnand %p3101_p0, %p3095_p1 }
  0x25   : > { %3105 = shalt.err (!%p3102_p6)
}
  0x26   : > { %s3238_s15 = smov 128   ;;  %s3239_s16 = smov 8  }
  0x27   : > { %2682 = dma.hbm_to_vmem [thread:$0]  (!%p3329_p11), %s4003_s1, 8192, %s3322_s28, [#allocation6], %s3238_s15, %s3238_s15, %s3239_s16  }
  0x28   : > { %s3106_s7 = scalar_lea.hbm %s4005_s3, 2048 }
  0x29   : > { %p3107_p2 = scmp.ne.s32.totalorder %s4005_s3, %s3106_s7  ;;  %p3113_p10 = scmp.lt.u32.totalorder %s3106_s7, %s4005_s3 }
  0x2b   : > { %p3109_p1 = pnand %p3107_p2, %p3080_p13 }
  0x2d   : > { %p3110_p6 = pneg %p3109_p1 }
  0x2f   : > { %p3115_p3 = pnand %p3113_p10, %p3110_p6 }
  0x31   : > { %3118 = shalt.err (!%p3115_p3)
}
  0x32   : > { %s3119_s28 = scalar_lea.vmem %s3333_s6, 2048  ;;  %p3127_p12 = scmp.lt.s32.totalorder %s3333_s6, %s3333_s6 }
  0x33   : > { %p3120_p5 = scmp.ne.s32.totalorder %s3333_s6, %s3119_s28  ;;  %p3128_p0 = scmp.lt.s32.totalorder %s3119_s28, %s3119_s28 }
  0x35   : > { %p3122_p7 = pnand %p3120_p5, %p3080_p13  ;;  %p3129_p2 = por %p3128_p0, %p3127_p12 }
  0x37   : > { %p3123_p9 = pneg %p3122_p7 }
  0x39   : > { %p3130_p1 = pnand %p3129_p2, %p3123_p9 }
  0x3b   : > { %3133 = shalt.err (!%p3130_p1)
}
  0x3c   : > { %s3240_s12 = smov 64   ;;  %s3241_s13 = smov 4  }
  0x3d   : > { %2685 = dma.hbm_to_vmem [thread:$0]  (!%p3329_p11), %s4005_s3, 2048, %s3333_s6, [#allocation6], %s3240_s12, %s3240_s12, %s3241_s13  }
  0x3e   : > { %s3388_s16 = sadd.s32 1, %s3234_s21   ;;  %s29_s23 = sadd.s32 1, %s3230_s20 }
  0x3f   : > { %s26_s17 = ssub.s32 %s3234_s21, %s3388_s16  ;;  %p36_p6 = scmp.ne.s32.totalorder %s3230_s20, %s3226_s19 }
  0x40   : > { %p27_p13 = scmp.eq.s32.totalorder %s26_s17, 0  ;;  %p37_p10 = scmp.eq.s32.totalorder %s3234_s21, 0 }
  0x41   : > { %p4015_p5 = scmp.eq.s32.totalorder %s3299_s22, 1  ;;  %p2696_p9 = scmp.lt.s32.totalorder %s3234_s21, 2 }
  0x42   : > { %s3397_s27 = scalar_select %p27_p13, %s3230_s20, %s29_s23  }
  0x43   : > { %p38_p3 = por %p37_p10, %p36_p6  ;;  %p3401_p7 = por %p4015_p5, %p36_p6 }
  0x44   : > { %s208_s29 = sand.u32 1, %s3230_s20   ;;  %s2393_s6 = sshll.u32 %s3234_s21, 13 }
  0x45   : > { %s4016_s30 = scalar_select %p3401_p7, 1, 0 }
  0x46   : > { %s2233_s7 = sshll.u32 %s208_s29, 9  ;;  %s3411_s10 = scalar_lea.hbm %s4002_s0, %s2393_s6 }
  0x47   : > { %s212_s11 = scalar_lea.vmem [#allocation2], %s2233_s7  ;;  %p3415_p11 = pnand %p2696_p9, %p38_p3 }
  0x48   : > { %s220_s28 = sshll.u32 %s212_s11, 4  ;;  %s3419_s13 = scalar_lea.sflag [#allocation3], %s208_s29  ;;  %s3413_s28 = int_to_ptr.vmem [resolvable:$true] %s220_s28 }
  0x49   : > { %s3134_s14 = scalar_lea.hbm %s3411_s10, 8192  ;;  %p3136_p0 = pneg %p3415_p11 }
  0x4a   : > { %p3135_p12 = scmp.ne.s32.totalorder %s3411_s10, %s3134_s14  ;;  %s3139_s23 = scalar_lea.hbm %s4002_s0, 16384 }
  0x4b   : > { %p3140_p13 = scmp.lt.u32.totalorder %s3411_s10, %s4002_s0  ;;  %p3141_p6 = scmp.lt.u32.totalorder %s3139_s23, %s3134_s14 }
  0x4c   : > { %p3137_p2 = pnand %p3136_p0, %p3135_p12  ;;  %p3143_p3 = scmp.lt.u32.totalorder %s3134_s14, %s3411_s10 }
  0x4d   : > { %p3142_p10 = por %p3141_p6, %p3140_p13 }
  0x4e   : > { %p3138_p1 = pneg %p3137_p2 }
  0x4f   : > { %p3144_p5 = por %p3143_p3, %p3142_p10 }
  0x51   : > { %p3145_p9 = pnand %p3144_p5, %p3138_p1 }
  0x53   : > { %3148 = shalt.err (!%p3145_p9)
}
  0x54   : > { %s3149_s29 = scalar_lea.vmem %s3413_s28, 8192  ;;  %s3242_s8 = smov [#allocation2]  }
  0x55   : > { %p3150_p12 = scmp.ne.s32.totalorder %s3413_s28, %s3149_s29  ;;  %s3154_s9 = sshll.u32 %s3242_s8, 4  ;;  %s3155_s9 = int_to_ptr.vmem [resolvable:$false] %s3154_s9 }
  0x56   : > { %s3156_s11 = scalar_lea.vmem %s3155_s9, 16384  ;;  %p3157_p4 = scmp.lt.s32.totalorder %s3413_s28, %s3155_s9 }
  0x57   : > { %p3152_p2 = pnand %p3150_p12, %p3136_p0  ;;  %p3158_p13 = scmp.lt.s32.totalorder %s3156_s11, %s3149_s29 }
  0x59   : > { %p3153_p7 = pneg %p3152_p2  ;;  %p3159_p6 = por %p3158_p13, %p3157_p4 }
  0x5b   : > { %p3160_p10 = pnand %p3159_p6, %p3153_p7 }
  0x5d   : > { %3163 = shalt.err (!%p3160_p10)
}
  0x5e   : > { %s3243_s14 = smov 256   ;;  %s3244_s15 = smov 16  }
  0x5f   : > { %2689 = dma.hbm_to_vmem [thread:$0]  (!%p3415_p11), %s3411_s10, 8192, %s3413_s28, %s3419_s13, %s3243_s14, %s3243_s14, %s3244_s15  }
  0x60   : > { %232 = sbr.rel (%p3318_p8) target bundleno = 830 (0x33e), region = 40 }
  0x67   : > { %s3450_s17 = sand.u32 1, %s3226_s19   ;;  %p4018_p4 = scmp.ne.s32.totalorder %s4011_s24, 0 }
  0x68   : > { %s2238_s23 = sshll.u32 %s3450_s17, 9  ;;  %s235_s7 = scalar_lea.sflag [#allocation3], %s3450_s17 }
  0x69   : > { %s3454_s6 = scalar_lea.vmem [#allocation2], %s2238_s23 }
  0x6a   : > { %3209 = dma.done.wait (%p4018_p4), %s235_s7, 8192  }
  0x6b   : > { %3211 = vsyncadd (%p4018_p4), %s235_s7, 4294959104  ;;  %p4019_p7 = scmp.eq.s32.totalorder %s3299_s22, 0 }
  0x6d   : > { %3213 = dma.done.wait (%p4019_p7), [#allocation6], 10240   ;;  %p4020_p8 = pmov %p4019_p7 }
  0x6e   : > { %v2742_v0 = vld [vmem:[#allocation5 + $0x4] ss:$8 sps:$4 sm:$0xff]   ;;  %v2744_v1 = vld [vmem:[#allocation5] ss:$8 sps:$4 sm:$0xff]   ;;  %v2745_v2 = vld [vmem:[#allocation5 + $0x14] ss:$8 sps:$4 sm:$0xff]  }
  0x6f   : > { %3215 = vsyncadd (%p4020_p8), [#allocation6], 4294957056  ;;  %1056 = vmatprep.subr.bf16.mxu0 %v2742_v0  ;;  %2507 = vmatprep.subr.bf16.mxu1 %v2742_v0  ;;  %v2747_v3 = vld [vmem:[#allocation5 + $0x10] ss:$8 sps:$4 sm:$0xff]   ;;  %v2748_v4 = vld [vmem:[#allocation5 + $0x24] ss:$8 sps:$4 sm:$0xff]  }
  0x70   : > { %1057 = vmatpush1.bf16.msra.mxu0 %v2744_v1  ;;  %2523 = vmatpush1.bf16.msra.mxu1 %v2744_v1  ;;  %v2750_v5 = vld [vmem:[#allocation5 + $0x20] ss:$8 sps:$4 sm:$0xff]   ;;  %v2751_v6 = vld [vmem:[#allocation5 + $0x34] ss:$8 sps:$4 sm:$0xff]   ;;  %v2753_v7 = vld [vmem:[#allocation5 + $0x30] ss:$8 sps:$4 sm:$0xff]  }
  0x71   : > { %1058 = vmatprep.subr.bf16.mxu0 %v2745_v2  ;;  %2508 = vmatprep.subr.bf16.mxu1 %v2745_v2  ;;  %v2754_v8 = vld [vmem:[#allocation5 + $0x44] ss:$8 sps:$4 sm:$0xff]   ;;  %v2756_v9 = vld [vmem:[#allocation5 + $0x40] ss:$8 sps:$4 sm:$0xff]   ;;  %v2757_v10 = vld [vmem:[#allocation5 + $0x54] ss:$8 sps:$4 sm:$0xff]  }
  0x72   : > { %v2759_v11 = vld [vmem:[#allocation5 + $0x50] ss:$8 sps:$4 sm:$0xff]   ;;  %v2760_v12 = vld [vmem:[#allocation5 + $0x64] ss:$8 sps:$4 sm:$0xff]   ;;  %v2762_v14 = vld [vmem:[#allocation5 + $0x60] ss:$8 sps:$4 sm:$0xff]  }
  0x73   : > { %v2792_v13 = vld [vmem:[%s3454_s6 + $0x4] ss:$16 sps:$4 sm:$0xff]   ;;  %v2765_v16 = vld [vmem:[#allocation5 + $0x70] ss:$8 sps:$4 sm:$0xff]   ;;  %v2768_v18 = vld [vmem:[#allocation5 + $0x80] ss:$8 sps:$4 sm:$0xff]  }
  0x74   : > { %1059 = vmatpush1.bf16.msra.mxu0 %v2747_v3  ;;  %2524 = vmatpush1.bf16.msra.mxu1 %v2747_v3  ;;  %v2763_v15 = vld [vmem:[#allocation5 + $0x74] ss:$8 sps:$4 sm:$0xff]   ;;  %v2766_v17 = vld [vmem:[#allocation5 + $0x84] ss:$8 sps:$4 sm:$0xff]   ;;  %v2771_v20 = vld [vmem:[#allocation5 + $0x90] ss:$8 sps:$4 sm:$0xff]  }
  0x75   : > { %1060 = vmatprep.subr.bf16.mxu0 %v2748_v4  ;;  %2509 = vmatprep.subr.bf16.mxu1 %v2748_v4  ;;  %v2769_v19 = vld [vmem:[#allocation5 + $0x94] ss:$8 sps:$4 sm:$0xff]   ;;  %v2772_v21 = vld [vmem:[#allocation5 + $0xa4] ss:$8 sps:$4 sm:$0xff]   ;;  %v2774_v22 = vld [vmem:[#allocation5 + $0xa0] ss:$8 sps:$4 sm:$0xff]  }
  0x76   : > { %1088 = vmatprep.mubr.bf16.mxu0 %v2792_v13  ;;  %v2775_v23 = vld [vmem:[#allocation5 + $0xb4] ss:$8 sps:$4 sm:$0xff]   ;;  %v2777_v24 = vld [vmem:[#allocation5 + $0xb0] ss:$8 sps:$4 sm:$0xff]   ;;  %v2778_v25 = vld [vmem:[#allocation5 + $0xc4] ss:$8 sps:$4 sm:$0xff]  }
  0x77   : > { %v2780_v26 = vld [vmem:[#allocation5 + $0xc0] ss:$8 sps:$4 sm:$0xff]   ;;  %v2781_v27 = vld [vmem:[#allocation5 + $0xd4] ss:$8 sps:$4 sm:$0xff]   ;;  %v2783_v28 = vld [vmem:[#allocation5 + $0xd0] ss:$8 sps:$4 sm:$0xff]  }
  0x78   : > { %1061 = vmatpush1.bf16.msra.mxu0 %v2750_v5  ;;  %2525 = vmatpush1.bf16.msra.mxu1 %v2750_v5  ;;  %v2784_v29 = vld [vmem:[#allocation5 + $0xe4] ss:$8 sps:$4 sm:$0xff]   ;;  %v2786_v30 = vld [vmem:[#allocation5 + $0xe0] ss:$8 sps:$4 sm:$0xff]   ;;  %v2787_v31 = vld [vmem:[#allocation5 + $0xf4] ss:$8 sps:$4 sm:$0xff]  }
  0x79   : > { %1062 = vmatprep.subr.bf16.mxu0 %v2751_v6  ;;  %2510 = vmatprep.subr.bf16.mxu1 %v2751_v6  ;;  %v2789_v32 = vld [vmem:[#allocation5 + $0xf0] ss:$8 sps:$4 sm:$0xff]   ;;  %v2795_v33 = vld [vmem:[#allocation5 + $0x104] ss:$8 sps:$4 sm:$0xff]   ;;  %v2793_v35 = vld [vmem:[#allocation5 + $0x100] ss:$8 sps:$4 sm:$0xff]  }
  0x7a   : > { %v2790_v34 = vld [vmem:[%s3454_s6] ss:$16 sps:$4 sm:$0xff]   ;;  %v2798_v36 = vld [vmem:[#allocation5 + $0x114] ss:$8 sps:$4 sm:$0xff]   ;;  %v2804_v43 = vld [vmem:[#allocation5 + $0x124] ss:$8 sps:$4 sm:$0xff]  }
  0x7b   : > { %v2799_v37 = vld [vmem:[%s3454_s6 + $0x24] ss:$16 sps:$4 sm:$0xff]   ;;  %v2886_v38 = vld [vmem:[%s3454_s6 + $0x100] ss:$16 sps:$4 sm:$0xff]   ;;  %s2241_s10 = sshll.u32 %s3450_s17, 8  ;;  %s2394_s29 = sshll.u32 %s3299_s22, 12 }
  0x7c   : > { %1063 = vmatpush1.bf16.msra.mxu0 %v2753_v7  ;;  %2526 = vmatpush1.bf16.msra.mxu1 %v2753_v7  ;;  %v2888_v39 = vld [vmem:[%s3454_s6 + $0x104] ss:$16 sps:$4 sm:$0xff]   ;;  %v2796_v40 = vld [vmem:[#allocation5 + $0x110] ss:$8 sps:$4 sm:$0xff]   ;;  %v2802_v44 = vld [vmem:[#allocation5 + $0x120] ss:$8 sps:$4 sm:$0xff]   ;;  %s3953_s14 = scalar_lea.hbm %s4007_s5, %s2394_s29 }
  0x7d   : > { %1064 = vmatprep.subr.bf16.mxu0 %v2754_v8  ;;  %2511 = vmatprep.subr.bf16.mxu1 %v2754_v8  ;;  %v2892_v41 = vld [vmem:[%s3454_s6 + $0x124] ss:$16 sps:$4 sm:$0xff]   ;;  %v2801_v42 = vld [vmem:[%s3454_s6 + $0x20] ss:$16 sps:$4 sm:$0xff]   ;;  %s3886_s13 = scalar_lea.vmem [#allocation8], %s2241_s10  ;;  %s2123_s22 = scalar_lea.sflag [#allocation4], %s3450_s17 }
  0x7e   : > { %1168 = vmatprep.mubr.bf16.mxu1 %v2888_v39  ;;  %v2808_v45 = vld [vmem:[%s3454_s6 + $0x44] ss:$16 sps:$4 sm:$0xff]   ;;  %v2894_v47 = vld [vmem:[%s3454_s6 + $0x120] ss:$16 sps:$4 sm:$0xff]   ;;  %s2136_s8 = sshll.u32 %s3886_s13, 4  ;;  %p4023_p0 = scmp.ne.s32.totalorder %s4016_s30, 0  ;;  %s3955_s8 = int_to_ptr.vmem [resolvable:$true] %s2136_s8 }
  0x7f   : > { %v2807_v46 = vld [vmem:[#allocation5 + $0x134] ss:$8 sps:$4 sm:$0xff]   ;;  %v2805_v48 = vld [vmem:[#allocation5 + $0x130] ss:$8 sps:$4 sm:$0xff]   ;;  %v2813_v50 = vld [vmem:[#allocation5 + $0x144] ss:$8 sps:$4 sm:$0xff]  }
  0x80   : > { %1065 = vmatpush1.bf16.msra.mxu0 %v2756_v9  ;;  %2527 = vmatpush1.bf16.msra.mxu1 %v2756_v9  ;;  %v2898_v49 = vld [vmem:[%s3454_s6 + $0x144] ss:$16 sps:$4 sm:$0xff]   ;;  %v2810_v51 = vld [vmem:[%s3454_s6 + $0x40] ss:$16 sps:$4 sm:$0xff]   ;;  %s3164_s15 = scalar_lea.vmem %s3955_s8, 4096  ;;  %s3245_s23 = smov [#allocation8]  }
  0x81   : > { %1066 = vmatprep.subr.bf16.mxu0 %v2757_v10  ;;  %2512 = vmatprep.subr.bf16.mxu1 %v2757_v10  ;;  %v2811_v52 = vld [vmem:[#allocation5 + $0x140] ss:$8 sps:$4 sm:$0xff]   ;;  %v2817_v53 = vld [vmem:[%s3454_s6 + $0x64] ss:$16 sps:$4 sm:$0xff]   ;;  %v2814_v56 = vld [vmem:[#allocation5 + $0x150] ss:$8 sps:$4 sm:$0xff]   ;;  %p3165_p11 = scmp.ne.s32.totalorder %s3955_s8, %s3164_s15 }
  0x82   : > { %v2816_v54 = vld [vmem:[#allocation5 + $0x154] ss:$8 sps:$4 sm:$0xff]   ;;  %v2900_v55 = vld [vmem:[%s3454_s6 + $0x140] ss:$16 sps:$4 sm:$0xff]   ;;  %v2822_v58 = vld [vmem:[#allocation5 + $0x164] ss:$8 sps:$4 sm:$0xff]  }
  0x83   : > { %v2904_v57 = vld [vmem:[%s3454_s6 + $0x164] ss:$16 sps:$4 sm:$0xff]   ;;  %v2819_v59 = vld [vmem:[%s3454_s6 + $0x60] ss:$16 sps:$4 sm:$0xff]   ;;  %p3166_p1 = pnand %p3165_p11, %p4023_p0  ;;  %s3168_s7 = sshll.u32 %s3245_s23, 4  ;;  %s3169_s7 = int_to_ptr.vmem [resolvable:$false] %s3168_s7 }
  0x84   : > { %1067 = vmatpush1.bf16.msra.mxu0 %v2759_v11  ;;  %2528 = vmatpush1.bf16.msra.mxu1 %v2759_v11  ;;  %v2820_v60 = vld [vmem:[#allocation5 + $0x160] ss:$8 sps:$4 sm:$0xff]   ;;  %v2826_v61 = vld [vmem:[%s3454_s6 + $0x84] ss:$16 sps:$4 sm:$0xff]   ;;  %v2823_v1 = vld [vmem:[#allocation5 + $0x170] ss:$8 sps:$4 sm:$0xff]   ;;  %p3171_p5 = scmp.lt.s32.totalorder %s3955_s8, %s3169_s7 }
  0x85   : > { %1068 = vmatprep.subr.bf16.mxu0 %v2760_v12  ;;  %2513 = vmatprep.subr.bf16.mxu1 %v2760_v12  ;;  %v2825_v62 = vld [vmem:[#allocation5 + $0x174] ss:$8 sps:$4 sm:$0xff]   ;;  %v2906_v63 = vld [vmem:[%s3454_s6 + $0x160] ss:$16 sps:$4 sm:$0xff]   ;;  %v2831_v2 = vld [vmem:[#allocation5 + $0x184] ss:$8 sps:$4 sm:$0xff]   ;;  %p3167_p3 = pneg %p3166_p1 }
  0x86   : > { %v2910_v0 = vld [vmem:[%s3454_s6 + $0x184] ss:$16 sps:$4 sm:$0xff]   ;;  %v2828_v3 = vld [vmem:[%s3454_s6 + $0x80] ss:$16 sps:$4 sm:$0xff]  }
  0x87   : > { %v2829_v4 = vld [vmem:[#allocation5 + $0x180] ss:$8 sps:$4 sm:$0xff]   ;;  %v2835_v5 = vld [vmem:[%s3454_s6 + $0xa4] ss:$16 sps:$4 sm:$0xff]   ;;  %v2832_v9 = vld [vmem:[#allocation5 + $0x190] ss:$8 sps:$4 sm:$0xff]  }
  0x88   : > { %1069 = vmatpush1.bf16.msra.mxu0 %v2762_v14  ;;  %2529 = vmatpush1.bf16.msra.mxu1 %v2762_v14  ;;  %v2834_v6 = vld [vmem:[#allocation5 + $0x194] ss:$8 sps:$4 sm:$0xff]   ;;  %v2912_v7 = vld [vmem:[%s3454_s6 + $0x180] ss:$16 sps:$4 sm:$0xff]   ;;  %v2840_v10 = vld [vmem:[#allocation5 + $0x1a4] ss:$8 sps:$4 sm:$0xff]  }
  0x89   : > { %1070 = vmatprep.subr.bf16.mxu0 %v2763_v15  ;;  %2514 = vmatprep.subr.bf16.mxu1 %v2763_v15  ;;  %v2916_v8 = vld [vmem:[%s3454_s6 + $0x1a4] ss:$16 sps:$4 sm:$0xff]   ;;  %v2837_v11 = vld [vmem:[%s3454_s6 + $0xa0] ss:$16 sps:$4 sm:$0xff]  }
  0x8a   : > { %v2838_v12 = vld [vmem:[#allocation5 + $0x1a0] ss:$8 sps:$4 sm:$0xff]   ;;  %v2844_v13 = vld [vmem:[%s3454_s6 + $0xc4] ss:$16 sps:$4 sm:$0xff]  }
  0x8b   : > { %v2843_v14 = vld [vmem:[#allocation5 + $0x1b4] ss:$8 sps:$4 sm:$0xff]   ;;  %v2918_v15 = vld [vmem:[%s3454_s6 + $0x1a0] ss:$16 sps:$4 sm:$0xff]  }
  0x8c   : > { %1071 = vmatpush1.bf16.msra.mxu0 %v2765_v16  ;;  %2530 = vmatpush1.bf16.msra.mxu1 %v2765_v16  ;;  %v2922_v16 = vld [vmem:[%s3454_s6 + $0x1c4] ss:$16 sps:$4 sm:$0xff]  }
  0x8d   : > { %1072 = vmatprep.subr.bf16.mxu0 %v2766_v17  ;;  %2515 = vmatprep.subr.bf16.mxu1 %v2766_v17  ;;  %v2841_v17 = vld [vmem:[#allocation5 + $0x1b0] ss:$8 sps:$4 sm:$0xff]  }
  0x8e   : > { %v2938_v39 = vld [vmem:[#allocation7 + $0x50] sm:$0xff]  }
  0x90   : > { %1073 = vmatpush1.bf16.msra.mxu0 %v2768_v18  ;;  %2531 = vmatpush1.bf16.msra.mxu1 %v2768_v18  ;;  %v2849_v18 = vld [vmem:[#allocation5 + $0x1c4] ss:$8 sps:$4 sm:$0xff]  }
  0x91   : > { %1074 = vmatprep.subr.bf16.mxu0 %v2769_v19  ;;  %2516 = vmatprep.subr.bf16.mxu1 %v2769_v19  ;;  %v2846_v19 = vld [vmem:[%s3454_s6 + $0xc0] ss:$16 sps:$4 sm:$0xff]  }
  0x94   : > { %1075 = vmatpush1.bf16.msra.mxu0 %v2771_v20  ;;  %2532 = vmatpush1.bf16.msra.mxu1 %v2771_v20  ;;  %v2847_v20 = vld [vmem:[#allocation5 + $0x1c0] ss:$8 sps:$4 sm:$0xff]  }
  0x95   : > { %1076 = vmatprep.subr.bf16.mxu0 %v2772_v21  ;;  %2517 = vmatprep.subr.bf16.mxu1 %v2772_v21  ;;  %v2853_v21 = vld [vmem:[%s3454_s6 + $0xe4] ss:$16 sps:$4 sm:$0xff]  }
  0x98   : > { %1077 = vmatpush1.bf16.msra.mxu0 %v2774_v22  ;;  %2533 = vmatpush1.bf16.msra.mxu1 %v2774_v22  ;;  %v2852_v22 = vld [vmem:[#allocation5 + $0x1d4] ss:$8 sps:$4 sm:$0xff]  }
  0x99   : > { %1078 = vmatprep.subr.bf16.mxu0 %v2775_v23  ;;  %2518 = vmatprep.subr.bf16.mxu1 %v2775_v23  ;;  %v2924_v23 = vld [vmem:[%s3454_s6 + $0x1c0] ss:$16 sps:$4 sm:$0xff]  }
  0x9c   : > { %1079 = vmatpush1.bf16.msra.mxu0 %v2777_v24  ;;  %2534 = vmatpush1.bf16.msra.mxu1 %v2777_v24  ;;  %v2928_v24 = vld [vmem:[%s3454_s6 + $0x1e4] ss:$16 sps:$4 sm:$0xff]  }
  0x9d   : > { %1080 = vmatprep.subr.bf16.mxu0 %v2778_v25  ;;  %2519 = vmatprep.subr.bf16.mxu1 %v2778_v25  ;;  %v2850_v25 = vld [vmem:[#allocation5 + $0x1d0] ss:$8 sps:$4 sm:$0xff]  }
  0xa0   : > { %1081 = vmatpush1.bf16.msra.mxu0 %v2780_v26  ;;  %2535 = vmatpush1.bf16.msra.mxu1 %v2780_v26  ;;  %v2858_v26 = vld [vmem:[#allocation5 + $0x1e4] ss:$8 sps:$4 sm:$0xff]  }
  0xa1   : > { %1082 = vmatprep.subr.bf16.mxu0 %v2781_v27  ;;  %2520 = vmatprep.subr.bf16.mxu1 %v2781_v27  ;;  %v2855_v27 = vld [vmem:[%s3454_s6 + $0xe0] ss:$16 sps:$4 sm:$0xff]  }
  0xa4   : > { %1083 = vmatpush1.bf16.msra.mxu0 %v2783_v28  ;;  %2536 = vmatpush1.bf16.msra.mxu1 %v2783_v28  ;;  %v2856_v28 = vld [vmem:[#allocation5 + $0x1e0] ss:$8 sps:$4 sm:$0xff]  }
  0xa5   : > { %1084 = vmatprep.subr.bf16.mxu0 %v2784_v29  ;;  %2521 = vmatprep.subr.bf16.mxu1 %v2784_v29  ;;  %v2864_v29 = vld [vmem:[%s3454_s6 + $0xc] ss:$16 sps:$4 sm:$0xff]  }
  0xa8   : > { %1085 = vmatpush1.bf16.msra.mxu0 %v2786_v30  ;;  %2537 = vmatpush1.bf16.msra.mxu1 %v2786_v30  ;;  %v2861_v30 = vld [vmem:[#allocation5 + $0x1f4] ss:$8 sps:$4 sm:$0xff]  }
  0xa9   : > { %1086 = vmatprep.subr.bf16.mxu0 %v2787_v31  ;;  %2522 = vmatprep.subr.bf16.mxu1 %v2787_v31  ;;  %v2930_v31 = vld [vmem:[%s3454_s6 + $0x1e0] ss:$16 sps:$4 sm:$0xff]  }
  0xac   : > { %1087 = vmatpush1.bf16.msra.mxu0 %v2789_v32  ;;  %2538 = vmatpush1.bf16.msra.mxu1 %v2789_v32  ;;  %v2934_v32 = vld [vmem:[#allocation7 + $0x40] sm:$0xff]  }
  0xad   : > { %1249 = vmatprep.subr.bf16.mxu0 %v2795_v33  ;;  %v2935_v33 = vld [vmem:[#allocation7] sm:$0xff]   ;;  %2395 = vmatprep.subr.bf16.mxu1 %v2934_v32 }
  0xaf   : > { %1089 = vmatmul.mubr.bf16.vlgmr.msra.gmra.mrb[0].mxu0 %v2790_v34  ;;  %1169 = vmatmul.mubr.bf16.vlgmr.msra.gmra.mrb[0].mxu1 %v2886_v38  ;;  %v2859_v34 = vld [vmem:[#allocation5 + $0x1f0] ss:$8 sps:$4 sm:$0xff]   ;;  %v2865_v38 = vld [vmem:[%s3454_s6 + $0x2c] ss:$16 sps:$4 sm:$0xff]  }
  0xb0   : > { %1250 = vmatpush1.bf16.msra.mxu0 %v2793_v35  ;;  %1098 = vmatprep.mubr.bf16.mxu0 %v2799_v37  ;;  %v2936_v35 = vld [vmem:[#allocation7 + $0x48] sm:$0xff]  }
  0xb1   : > { %1251 = vmatprep.subr.bf16.mxu0 %v2798_v36  ;;  %1178 = vmatprep.mubr.bf16.mxu1 %v2892_v41  ;;  %v2862_v36 = vld [vmem:[%s3454_s6 + $0x8] ss:$16 sps:$4 sm:$0xff]  }
  0xb2   : > { %2396 = vmatpush3.bf16.msra.mxu1 %v2935_v33  ;;  %v2937_v37 = vld [vmem:[#allocation7 + $0x8] sm:$0xff]   ;;  %v2940_v41 = vld [vmem:[#allocation7 + $0x58] sm:$0xff]  }
  0xb3   : > { %2397 = vmatprep.subr.bf16.mxu1 %v2936_v35 }
  0xb4   : > { %1252 = vmatpush1.bf16.msra.mxu0 %v2796_v40  ;;  %v2939_v40 = vld [vmem:[#allocation7 + $0x10] sm:$0xff]  }
  0xb5   : > { %1253 = vmatprep.subr.bf16.mxu0 %v2804_v43  ;;  %v2941_v43 = vld [vmem:[#allocation7 + $0x18] sm:$0xff]  }
  0xb6   : > { %2398 = vmatpush3.bf16.msra.mxu1 %v2937_v37 }
  0xb7   : > { %1099 = vmatmul.mubr.bf16.gmra.mrb[4].mxu0 %v2801_v42  ;;  %1179 = vmatmul.mubr.bf16.gmra.mrb[4].mxu1 %v2894_v47  ;;  %v2867_v42 = vld [vmem:[%s3454_s6 + $0x28] ss:$16 sps:$4 sm:$0xff]  }
  0xb8   : > { %1254 = vmatpush1.bf16.msra.mxu0 %v2802_v44  ;;  %1108 = vmatprep.mubr.bf16.mxu0 %v2808_v45  ;;  %v2868_v44 = vld [vmem:[%s3454_s6 + $0x4c] ss:$16 sps:$4 sm:$0xff]   ;;  %v2942_v45 = vld [vmem:[#allocation7 + $0x60] sm:$0xff]   ;;  %v2870_v47 = vld [vmem:[%s3454_s6 + $0x48] ss:$16 sps:$4 sm:$0xff]  }
  0xb9   : > { %1255 = vmatprep.subr.bf16.mxu0 %v2807_v46  ;;  %1188 = vmatprep.mubr.bf16.mxu1 %v2898_v49  ;;  %v2943_v46 = vld [vmem:[#allocation7 + $0x20] sm:$0xff]   ;;  %v2873_v49 = vld [vmem:[%s3454_s6 + $0x68] ss:$16 sps:$4 sm:$0xff]  }
  0xba   : > { %2399 = vmatprep.subr.bf16.mxu1 %v2938_v39 }
  0xbb   : > { %2400 = vmatpush3.bf16.msra.mxu1 %v2939_v40  ;;  %v406_v40 = vlaneseq }
  0xbc   : > { %1256 = vmatpush1.bf16.msra.mxu0 %v2805_v48  ;;  %2401 = vmatprep.subr.bf16.mxu1 %v2940_v41  ;;  %v2871_v48 = vld [vmem:[%s3454_s6 + $0x6c] ss:$16 sps:$4 sm:$0xff]  }
  0xbd   : > { %1257 = vmatprep.subr.bf16.mxu0 %v2813_v50  ;;  %v2874_v50 = vld [vmem:[%s3454_s6 + $0x8c] ss:$16 sps:$4 sm:$0xff]  }
  0xbf   : > { %1109 = vmatmul.mubr.bf16.gmra.mrb[8].mxu0 %v2810_v51  ;;  %1189 = vmatmul.mubr.bf16.gmra.mrb[8].mxu1 %v2900_v55  ;;  %v2876_v51 = vld [vmem:[%s3454_s6 + $0x88] ss:$16 sps:$4 sm:$0xff]  }
  0xc0   : > { %1258 = vmatpush1.bf16.msra.mxu0 %v2811_v52  ;;  %1118 = vmatprep.mubr.bf16.mxu0 %v2817_v53  ;;  %v2877_v52 = vld [vmem:[%s3454_s6 + $0xac] ss:$16 sps:$4 sm:$0xff]   ;;  %v2879_v53 = vld [vmem:[%s3454_s6 + $0xa8] ss:$16 sps:$4 sm:$0xff]  }
  0xc1   : > { %1259 = vmatprep.subr.bf16.mxu0 %v2816_v54  ;;  %1198 = vmatprep.mubr.bf16.mxu1 %v2904_v57  ;;  %v2880_v54 = vld [vmem:[%s3454_s6 + $0xcc] ss:$16 sps:$4 sm:$0xff]   ;;  %v2882_v55 = vld [vmem:[%s3454_s6 + $0xc8] ss:$16 sps:$4 sm:$0xff]  }
  0xc2   : > { %2402 = vmatpush3.bf16.msra.mxu1 %v2941_v43  ;;  %v2885_v57 = vld [vmem:[%s3454_s6 + $0xe8] ss:$16 sps:$4 sm:$0xff]   ;;  %v407_v43 = vshrl.u32 %v406_v40, 7 }
  0xc3   : > { %2403 = vmatprep.subr.bf16.mxu1 %v2942_v45 }
  0xc4   : > { %1260 = vmatpush1.bf16.msra.mxu0 %v2814_v56  ;;  %v2883_v56 = vld [vmem:[%s3454_s6 + $0xec] ss:$16 sps:$4 sm:$0xff]  }
  0xc5   : > { %1261 = vmatprep.subr.bf16.mxu0 %v2822_v58  ;;  %v2889_v58 = vld [vmem:[%s3454_s6 + $0x10c] ss:$16 sps:$4 sm:$0xff]  }
  0xc6   : > { %2404 = vmatpush3.bf16.msra.mxu1 %v2943_v46  ;;  %v408_v46 = vsub.s32 0, %v407_v43 }
  0xc7   : > { %1119 = vmatmul.mubr.bf16.gmra.mrb[12].mxu0 %v2819_v59  ;;  %1199 = vmatmul.mubr.bf16.gmra.mrb[12].mxu1 %v2906_v63  ;;  %v2891_v59 = vld [vmem:[%s3454_s6 + $0x108] ss:$16 sps:$4 sm:$0xff]  }
  0xc8   : > { %1262 = vmatpush1.bf16.msra.mxu0 %v2820_v60  ;;  %1128 = vmatprep.mubr.bf16.mxu0 %v2826_v61  ;;  %v2895_v60 = vld [vmem:[%s3454_s6 + $0x12c] ss:$16 sps:$4 sm:$0xff]   ;;  %v2897_v61 = vld [vmem:[%s3454_s6 + $0x128] ss:$16 sps:$4 sm:$0xff]  }
  0xc9   : > { %1263 = vmatprep.subr.bf16.mxu0 %v2825_v62  ;;  %1208 = vmatprep.mubr.bf16.mxu1 %v2910_v0  ;;  %v2901_v62 = vld [vmem:[%s3454_s6 + $0x14c] ss:$16 sps:$4 sm:$0xff]   ;;  %v2903_v63 = vld [vmem:[%s3454_s6 + $0x148] ss:$16 sps:$4 sm:$0xff]  }
  0xca   : > { %v2907_v0 = vld [vmem:[%s3454_s6 + $0x16c] ss:$16 sps:$4 sm:$0xff]  }
  0xcc   : > { %1264 = vmatpush1.bf16.msra.mxu0 %v2823_v1  ;;  %v2909_v1 = vld [vmem:[%s3454_s6 + $0x168] ss:$16 sps:$4 sm:$0xff]  }
  0xcd   : > { %1265 = vmatprep.subr.bf16.mxu0 %v2831_v2  ;;  %v2913_v2 = vld [vmem:[%s3454_s6 + $0x18c] ss:$16 sps:$4 sm:$0xff]  }
  0xcf   : > { %1129 = vmatmul.mubr.bf16.gmra.mrb[16].mxu0 %v2828_v3  ;;  %1209 = vmatmul.mubr.bf16.gmra.mrb[16].mxu1 %v2912_v7  ;;  %v2915_v3 = vld [vmem:[%s3454_s6 + $0x188] ss:$16 sps:$4 sm:$0xff]   ;;  %v2946_v7 = vld [vmem:[#allocation7 + $0x70] sm:$0xff]  }
  0xd0   : > { %1266 = vmatpush1.bf16.msra.mxu0 %v2829_v4  ;;  %1138 = vmatprep.mubr.bf16.mxu0 %v2835_v5  ;;  %v2919_v4 = vld [vmem:[%s3454_s6 + $0x1ac] ss:$16 sps:$4 sm:$0xff]  }
  0xd1   : > { %1267 = vmatprep.subr.bf16.mxu0 %v2834_v6  ;;  %1218 = vmatprep.mubr.bf16.mxu1 %v2916_v8  ;;  %v2944_v5 = vld [vmem:[#allocation7 + $0x68] sm:$0xff]  }
  0xd2   : > { %v2945_v6 = vld [vmem:[#allocation7 + $0x28] sm:$0xff]   ;;  %2405 = vmatprep.subr.bf16.mxu1 %v2944_v5 }
  0xd3   : > { %2406 = vmatpush3.bf16.msra.mxu1 %v2945_v6  ;;  %v2921_v8 = vld [vmem:[%s3454_s6 + $0x1a8] ss:$16 sps:$4 sm:$0xff]  }
  0xd4   : > { %1268 = vmatpush1.bf16.msra.mxu0 %v2832_v9  ;;  %v2947_v9 = vld [vmem:[#allocation7 + $0x30] sm:$0xff]   ;;  %2407 = vmatprep.subr.bf16.mxu1 %v2946_v7 }
  0xd5   : > { %1269 = vmatprep.subr.bf16.mxu0 %v2840_v10  ;;  %v2925_v10 = vld [vmem:[%s3454_s6 + $0x1cc] ss:$16 sps:$4 sm:$0xff]  }
  0xd7   : > { %1139 = vmatmul.mubr.bf16.gmra.mrb[20].mxu0 %v2837_v11  ;;  %1219 = vmatmul.mubr.bf16.gmra.mrb[20].mxu1 %v2918_v15  ;;  %v2948_v11 = vld [vmem:[#allocation7 + $0x78] sm:$0xff]  }
  0xd8   : > { %1270 = vmatpush1.bf16.msra.mxu0 %v2838_v12  ;;  %1148 = vmatprep.mubr.bf16.mxu0 %v2844_v13  ;;  %v2949_v12 = vld [vmem:[#allocation7 + $0x38] sm:$0xff]  }
  0xd9   : > { %1271 = vmatprep.subr.bf16.mxu0 %v2843_v14  ;;  %1228 = vmatprep.mubr.bf16.mxu1 %v2922_v16  ;;  %v2927_v13 = vld [vmem:[%s3454_s6 + $0x1c8] ss:$16 sps:$4 sm:$0xff]   ;;  %v2931_v14 = vld [vmem:[%s3454_s6 + $0x1ec] ss:$16 sps:$4 sm:$0xff]  }
  0xda   : > { %2408 = vmatpush3.bf16.msra.mxu1 %v2947_v9  ;;  %v2933_v15 = vld [vmem:[%s3454_s6 + $0x1e8] ss:$16 sps:$4 sm:$0xff]   ;;  %s3170_s6 = scalar_lea.vmem %s3169_s7, 8192 }
  0xdb   : > { %2409 = vmatprep.subr.bf16.mxu1 %v2948_v11  ;;  %p3172_p9 = scmp.lt.s32.totalorder %s3170_s6, %s3164_s15 }
  0xdc   : > { %1272 = vmatpush1.bf16.msra.mxu0 %v2841_v17 }
  0xdd   : > { %1273 = vmatprep.subr.bf16.mxu0 %v2849_v18  ;;  %p3173_p12 = por %p3172_p9, %p3171_p5 }
  0xde   : > { %2410 = vmatpush3.bf16.msra.mxu1 %v2949_v12 }
  0xdf   : > { %1149 = vmatmul.mubr.bf16.gmra.mrb[24].mxu0 %v2846_v19  ;;  %1229 = vmatmul.mubr.bf16.gmra.mrb[24].mxu1 %v2924_v23  ;;  %p3174_p2 = pnand %p3173_p12, %p3167_p3 }
  0xe0   : > { %1274 = vmatpush1.bf16.msra.mxu0 %v2847_v20  ;;  %1158 = vmatprep.mubr.bf16.mxu0 %v2853_v21 }
  0xe1   : > { %1275 = vmatprep.subr.bf16.mxu0 %v2852_v22  ;;  %1238 = vmatprep.mubr.bf16.mxu1 %v2928_v24 }
  0xe4   : > { %1276 = vmatpush1.bf16.msra.mxu0 %v2850_v25 }
  0xe5   : > { %1277 = vmatprep.subr.bf16.mxu0 %v2858_v26 }
  0xe7   : > { %1159 = vmatmul.mubr.bf16.gmra.mrb[28].mxu0 %v2855_v27  ;;  %1239 = vmatmul.mubr.bf16.gmra.mrb[28].mxu1 %v2930_v31 }
  0xe8   : > { %1278 = vmatpush1.bf16.msra.mxu0 %v2856_v28  ;;  %1281 = vmatprep.mubr.bf16.mxu0 %v2864_v29 }
  0xe9   : > { %1279 = vmatprep.subr.bf16.mxu0 %v2861_v30 }
  0xec   : > { %1280 = vmatpush1.bf16.msra.mxu0 %v2859_v34 }
  0xef   : > { %1282 = vmatmul.mubr.bf16.vlgmr.msra.gmra.mrb[0].mxu0 %v2862_v36 }
  0xf0   : > { %1291 = vmatprep.mubr.bf16.mxu0 %v2865_v38 }
  0xf7   : > { %1292 = vmatmul.mubr.bf16.gmra.mrb[4].mxu0 %v2867_v42 }
  0xf8   : > { %1301 = vmatprep.mubr.bf16.mxu0 %v2868_v44 }
  0xff   : > { %1302 = vmatmul.mubr.bf16.gmra.mrb[8].mxu0 %v2870_v47  ;;  %v404_v47 = vld [vmem:[%s4004_s2] sm:$0x3] }
 0x100   : > { %1311 = vmatprep.mubr.bf16.mxu0 %v2871_v48  ;;  %v412_v48 = vsub.s32 1, %v407_v43 }
 0x107   : > { %1312 = vmatmul.mubr.bf16.gmra.mrb[12].mxu0 %v2873_v49 }
 0x108   : > { %1321 = vmatprep.mubr.bf16.mxu0 %v2874_v50 }
 0x10f   : > { %1322 = vmatmul.mubr.bf16.gmra.mrb[16].mxu0 %v2876_v51  ;;  %v3591_v51 = vrot.slane %v404_v47, %v408_v46 }
 0x110   : > { %1331 = vmatprep.mubr.bf16.mxu0 %v2877_v52 }
 0x117   : > { %1332 = vmatmul.mubr.bf16.gmra.mrb[20].mxu0 %v2879_v53  ;;  %v3595_v53 = vrot.slane %v404_v47, %v412_v48 }
 0x118   : > { %1341 = vmatprep.mubr.bf16.mxu0 %v2880_v54 }
 0x11f   : > { %1342 = vmatmul.mubr.bf16.gmra.mrb[24].mxu0 %v2882_v55 }
 0x120   : > { %1351 = vmatprep.mubr.bf16.mxu0 %v2883_v56 }
 0x127   : > { %1352 = vmatmul.mubr.bf16.gmra.mrb[28].mxu0 %v2885_v57 }
 0x128   : > { %1361 = vmatprep.mubr.bf16.mxu0 %v2889_v58 }
 0x12f   : > { %1362 = vmatmul.mubr.bf16.gmra.mrb[32].mxu0 %v2891_v59 }
 0x130   : > { %1371 = vmatprep.mubr.bf16.mxu0 %v2895_v60 }
 0x137   : > { %1372 = vmatmul.mubr.bf16.gmra.mrb[36].mxu0 %v2897_v61 }
 0x138   : > { %1381 = vmatprep.mubr.bf16.mxu0 %v2901_v62 }
 0x13f   : > { %1382 = vmatmul.mubr.bf16.gmra.mrb[40].mxu0 %v2903_v63 }
 0x140   : > { %1391 = vmatprep.mubr.bf16.mxu0 %v2907_v0 }
 0x147   : > { %1392 = vmatmul.mubr.bf16.gmra.mrb[44].mxu0 %v2909_v1 }
 0x148   : > { %1401 = vmatprep.mubr.bf16.mxu0 %v2913_v2 }
 0x14f   : > { %1402 = vmatmul.mubr.bf16.gmra.mrb[48].mxu0 %v2915_v3 }
 0x150   : > { %1411 = vmatprep.mubr.bf16.mxu0 %v2919_v4 }
 0x157   : > { %1412 = vmatmul.mubr.bf16.gmra.mrb[52].mxu0 %v2921_v8 }
 0x158   : > { %1421 = vmatprep.mubr.bf16.mxu0 %v2925_v10 }
 0x15f   : > { %1422 = vmatmul.mubr.bf16.gmra.mrb[56].mxu0 %v2927_v13 }
 0x160   : > { %1431 = vmatprep.mubr.bf16.mxu0 %v2931_v14 }
 0x167   : > { %1432 = vmatmul.mubr.bf16.gmra.mrb[60].mxu0 %v2933_v15 }
 0x182   : > { %v3528_v16 = vpop.f32.mrb[0].mxu1 }
 0x183   : > { %v3530_v17 = vpop.f32.mrb[1].mxu1 }
 0x184   : > { %v3532_v18 = vpop.f32.mrb[2].mxu1 }
 0x185   : > { %v3534_v19 = vpop.f32.mrb[3].mxu1 }
 0x18a   : > { %v3536_v20 = vpop.f32.mrb[4].mxu1 }
 0x18b   : > { %v3538_v21 = vpop.f32.mrb[5].mxu1 }
 0x18c   : > { %v3540_v22 = vpop.f32.mrb[6].mxu1 }
 0x18d   : > { %v3542_v23 = vpop.f32.mrb[7].mxu1 }
 0x192   : > { %v3544_v24 = vpop.f32.mrb[8].mxu1 }
 0x193   : > { %v3546_v25 = vpop.f32.mrb[9].mxu1 }
 0x194   : > { %v3548_v26 = vpop.f32.mrb[10].mxu1 }
 0x195   : > { %v3550_v27 = vpop.f32.mrb[11].mxu1 }
 0x19a   : > { %v3552_v28 = vpop.f32.mrb[12].mxu1 }
 0x19b   : > { %v3554_v29 = vpop.f32.mrb[13].mxu1 }
 0x19c   : > { %v3556_v30 = vpop.f32.mrb[14].mxu1 }
 0x19d   : > { %v3558_v31 = vpop.f32.mrb[15].mxu1 }
 0x1a2   : > { %v3560_v32 = vpop.f32.mrb[16].mxu1 }
 0x1a3   : > { %v3562_v33 = vpop.f32.mrb[17].mxu1 }
 0x1a4   : > { %v3564_v34 = vpop.f32.mrb[18].mxu1 }
 0x1a5   : > { %v3566_v35 = vpop.f32.mrb[19].mxu1 }
 0x1aa   : > { %v3568_v36 = vpop.f32.mrb[20].mxu1 }
 0x1ab   : > { %v3570_v37 = vpop.f32.mrb[21].mxu1 }
 0x1ac   : > { %v3572_v38 = vpop.f32.mrb[22].mxu1 }
 0x1ad   : > { %v3574_v39 = vpop.f32.mrb[23].mxu1 }
 0x1b2   : > { %v3576_v41 = vpop.f32.mrb[24].mxu1 }
 0x1b3   : > { %v3578_v42 = vpop.f32.mrb[25].mxu1 }
 0x1b4   : > { %v3580_v44 = vpop.f32.mrb[26].mxu1 }
 0x1b5   : > { %v3582_v45 = vpop.f32.mrb[27].mxu1 }
 0x1ba   : > { %v3587_v49 = vpop.f32.mrb[28].mxu1 }
 0x1bb   : > { %v3589_v50 = vpop.f32.mrb[29].mxu1 }
 0x1bc   : > { %v3593_v52 = vpop.f32.mrb[30].mxu1 }
 0x1bd   : > { %v3597_v54 = vpop.f32.mrb[31].mxu1 }
 0x1be   : > { %4021 = vst [vmem:[#allocation12_spill] sm:$0xff] %v3597_v54 }
 0x1c2   : > { %v1283_v55 = vpop.f32.mrb[0].mxu0 }
 0x1c3   : > { %v2539_v56 = vadd.f32 %v1283_v55, %v3591_v51  ;;  %v1285_v57 = vpop.f32.mrb[1].mxu0 }
 0x1c4   : > { %v2540_v58 = vadd.f32 %v1285_v57, %v3595_v53  ;;  %v1287_v59 = vpop.f32.mrb[2].mxu0 }
 0x1c5   : > { %v1506_v60 = vmul.f32 0.70710677, %v2539_v56  ;;  %v2541_v61 = vadd.f32 %v1287_v59, %v3591_v51  ;;  %v1289_v62 = vpop.f32.mrb[3].mxu0 }
 0x1c6   : > { %v1507_v63 = vmul.f32 0.70710677, %v2540_v58  ;;  %v2542_v0 = vadd.f32 %v1289_v62, %v3595_v53 }
 0x1c7   : > { %2950 = verf.f32 %v1506_v60  ;;  %v1508_v1 = vmul.f32 0.70710677, %v2541_v61  ;;  %v1442_v60 = vmul.f32 0.5, %v2539_v56  ;;  %v1444_v62 = vmul.f32 0.5, %v2541_v61 }
 0x1c8   : > { %2952 = verf.f32 %v1507_v63  ;;  %v1509_v2 = vmul.f32 0.70710677, %v2542_v0 }
 0x1c9   : > { %2954 = verf.f32 %v1508_v1 }
 0x1ca   : > { %2956 = verf.f32 %v1509_v2  ;;  %v1293_v3 = vpop.f32.mrb[4].mxu0 }
 0x1cb   : > { %v2543_v4 = vadd.f32 %v1293_v3, %v3591_v51  ;;  %v1295_v5 = vpop.f32.mrb[5].mxu0  ;;  %v1443_v3 = vmul.f32 0.5, %v2540_v58 }
 0x1cc   : > { %v2544_v6 = vadd.f32 %v1295_v5, %v3595_v53  ;;  %v1297_v7 = vpop.f32.mrb[6].mxu0  ;;  %v1445_v5 = vmul.f32 0.5, %v2542_v0 }
 0x1cd   : > { %v1510_v8 = vmul.f32 0.70710677, %v2543_v4  ;;  %v2545_v9 = vadd.f32 %v1297_v7, %v3591_v51  ;;  %v1299_v10 = vpop.f32.mrb[7].mxu0 }
 0x1ce   : > { %v1511_v11 = vmul.f32 0.70710677, %v2544_v6  ;;  %v2546_v12 = vadd.f32 %v1299_v10, %v3595_v53 }
 0x1cf   : > { %2958 = verf.f32 %v1510_v8  ;;  %v1512_v13 = vmul.f32 0.70710677, %v2545_v9 }
 0x1d0   : > { %2960 = verf.f32 %v1511_v11  ;;  %v1513_v14 = vmul.f32 0.70710677, %v2546_v12 }
 0x1d1   : > { %v2951_v15 = vpop.eup %2950  ;;  %2962 = verf.f32 %v1512_v13 }
 0x1d2   : > { %v2953_v40 = vpop.eup %2952  ;;  %v1634_v43 = vadd.f32 1.0, %v2951_v15  ;;  %2964 = verf.f32 %v1513_v14  ;;  %v1303_v46 = vpop.f32.mrb[8].mxu0 }
 0x1d3   : > { %v2955_v47 = vpop.eup %2954  ;;  %v1635_v48 = vadd.f32 1.0, %v2953_v40  ;;  %v3608_v55 = vadd.f32 %v1303_v46, %v3591_v51  ;;  %v1305_v57 = vpop.f32.mrb[9].mxu0 }
 0x1d4   : > { %v2957_v59 = vpop.eup %2956  ;;  %v1636_v63 = vadd.f32 1.0, %v2955_v47  ;;  %v3611_v1 = vadd.f32 %v1305_v57, %v3595_v53  ;;  %v1307_v2 = vpop.f32.mrb[10].mxu0  ;;  %v1698_v11 = vmul.f32 %v1634_v43, %v1442_v60 }
 0x1d5   : > { %v1637_v7 = vadd.f32 1.0, %v2957_v59  ;;  %v1514_v8 = vmul.f32 0.70710677, %v3608_v55  ;;  %v1309_v10 = vpop.f32.mrb[11].mxu0  ;;  %v2549_v15 = vadd.f32 %v1307_v2, %v3591_v51  ;;  %v1699_v40 = vmul.f32 %v1635_v48, %v1443_v3 }
 0x1d6   : > { %v1700_v13 = vmul.f32 %v1636_v63, %v1444_v62  ;;  %v1515_v14 = vmul.f32 0.70710677, %v3611_v1  ;;  %v2550_v61 = vadd.f32 %v1309_v10, %v3595_v53  ;;  %v1446_v3 = vmul.f32 0.5, %v2543_v4 }
 0x1d7   : > { %v1701_v56 = vmul.f32 %v1637_v7, %v1445_v5  ;;  %2966 = verf.f32 %v1514_v8  ;;  %v1516_v47 = vmul.f32 0.70710677, %v2549_v15  ;;  %v1448_v5 = vmul.f32 0.5, %v2545_v9 }
 0x1d8   : > { %v1762_v46 = vpack.c.bf16 %v1700_v13, %v1698_v11  ;;  %2968 = verf.f32 %v1515_v14  ;;  %v1517_v0 = vmul.f32 0.70710677, %v2550_v61  ;;  %v1447_v11 = vmul.f32 0.5, %v2544_v6 }
 0x1d9   : > { %v2959_v58 = vpop.eup %2958  ;;  %v1763_v57 = vpack.c.bf16 %v1701_v56, %v1699_v40  ;;  %2970 = verf.f32 %v1516_v47  ;;  %v1449_v13 = vmul.f32 0.5, %v2546_v12 }
 0x1da   : > { %v2961_v59 = vpop.eup %2960  ;;  %v1638_v54 = vadd.f32 1.0, %v2959_v58  ;;  %v1313_v43 = vpop.f32.mrb[12].mxu0  ;;  %2972 = verf.f32 %v1517_v0 }
 0x1db   : > { %v2963_v60 = vpop.eup %2962  ;;  %v1639_v62 = vadd.f32 1.0, %v2961_v59  ;;  %v3618_v63 = vadd.f32 %v1313_v43, %v3591_v51  ;;  %v1315_v48 = vpop.f32.mrb[13].mxu0  ;;  %1961 = vmatprep.mubr.bf16.mxu1 %v1763_v57 }
 0x1dc   : > { %v2965_v2 = vpop.eup %2964  ;;  %v1640_v7 = vadd.f32 1.0, %v2963_v60  ;;  %v3621_v8 = vadd.f32 %v1315_v48, %v3595_v53  ;;  %v1317_v10 = vpop.f32.mrb[14].mxu0  ;;  %1962 = vmatmul.mubr.bf16.vlgmr.msra.gmra.mrb[32].mxu1 %v1762_v46  ;;  %v1702_v47 = vmul.f32 %v1638_v54, %v1446_v3 }
 0x1dd   : > { %v1641_v14 = vadd.f32 1.0, %v2965_v2  ;;  %v1518_v40 = vmul.f32 0.70710677, %v3618_v63  ;;  %v1319_v56 = vpop.f32.mrb[15].mxu0  ;;  %v2553_v57 = vadd.f32 %v1317_v10, %v3591_v51  ;;  %v1703_v4 = vmul.f32 %v1639_v62, %v1447_v11 }
 0x1de   : > { %v1704_v58 = vmul.f32 %v1640_v7, %v1448_v5  ;;  %v1519_v0 = vmul.f32 0.70710677, %v3621_v8  ;;  %v2554_v59 = vadd.f32 %v1319_v56, %v3595_v53  ;;  %v1450_v7 = vmul.f32 0.5, %v3608_v55 }
 0x1df   : > { %v1705_v9 = vmul.f32 %v1641_v14, %v1449_v13  ;;  %2974 = verf.f32 %v1518_v40  ;;  %v1520_v43 = vmul.f32 0.70710677, %v2553_v57  ;;  %v1451_v40 = vmul.f32 0.5, %v3611_v1 }
 0x1e0   : > { %2976 = verf.f32 %v1519_v0  ;;  %v1764_v46 = vpack.c.bf16 %v1704_v58, %v1702_v47  ;;  %v1521_v12 = vmul.f32 0.70710677, %v2554_v59  ;;  %v1452_v56 = vmul.f32 0.5, %v2549_v15 }
 0x1e1   : > { %v2967_v6 = vpop.eup %2966  ;;  %v1765_v60 = vpack.c.bf16 %v1705_v9, %v1703_v4  ;;  %2978 = verf.f32 %v1520_v43  ;;  %v1453_v4 = vmul.f32 0.5, %v2550_v61 }
 0x1e2   : > { %v2969_v48 = vpop.eup %2968  ;;  %v1323_v2 = vpop.f32.mrb[16].mxu0  ;;  %v1642_v54 = vadd.f32 1.0, %v2967_v6  ;;  %2980 = verf.f32 %v1521_v12 }
 0x1e3   : > { %v3628_v3 = vadd.f32 %v1323_v2, %v3591_v51  ;;  %v1325_v5 = vpop.f32.mrb[17].mxu0  ;;  %1969 = vmatprep.mubr.bf16.mxu1 %v1765_v60  ;;  %v2971_v62 = vpop.eup %2970  ;;  %v1643_v10 = vadd.f32 1.0, %v2969_v48 }
 0x1e4   : > { %v3632_v11 = vadd.f32 %v1325_v5, %v3595_v53  ;;  %v1327_v13 = vpop.f32.mrb[18].mxu0  ;;  %1970 = vmatmul.mubr.bf16.gmra.mrb[36].mxu1 %v1764_v46  ;;  %v2973_v14 = vpop.eup %2972  ;;  %v1644_v47 = vadd.f32 1.0, %v2971_v62  ;;  %v1706_v6 = vmul.f32 %v1642_v54, %v1450_v7 }
 0x1e5   : > { %v1522_v58 = vmul.f32 0.70710677, %v3628_v3  ;;  %v1329_v0 = vpop.f32.mrb[19].mxu0  ;;  %v1645_v9 = vadd.f32 1.0, %v2973_v14  ;;  %v3638_v55 = vadd.f32 %v1327_v13, %v3591_v51  ;;  %v1707_v60 = vmul.f32 %v1643_v10, %v1451_v40 }
 0x1e6   : > { %v1523_v43 = vmul.f32 0.70710677, %v3632_v11  ;;  %v1708_v12 = vmul.f32 %v1644_v47, %v1452_v56  ;;  %v3641_v46 = vadd.f32 %v1329_v0, %v3595_v53  ;;  %v1454_v10 = vmul.f32 0.5, %v3618_v63 }
 0x1e7   : > { %2982 = verf.f32 %v1522_v58  ;;  %v1709_v1 = vmul.f32 %v1645_v9, %v1453_v4  ;;  %v1524_v15 = vmul.f32 0.70710677, %v3638_v55  ;;  %v1455_v4 = vmul.f32 0.5, %v3621_v8 }
 0x1e8   : > { %2984 = verf.f32 %v1523_v43  ;;  %v1525_v61 = vmul.f32 0.70710677, %v3641_v46  ;;  %v1766_v2 = vpack.c.bf16 %v1708_v12, %v1706_v6  ;;  %v1456_v9 = vmul.f32 0.5, %v2553_v57 }
 0x1e9   : > { %v2975_v48 = vpop.eup %2974  ;;  %2986 = verf.f32 %v1524_v15  ;;  %v1767_v13 = vpack.c.bf16 %v1709_v1, %v1707_v60  ;;  %v1457_v60 = vmul.f32 0.5, %v2554_v59 }
 0x1ea   : > { %v2977_v5 = vpop.eup %2976  ;;  %v1333_v62 = vpop.f32.mrb[20].mxu0  ;;  %v1646_v14 = vadd.f32 1.0, %v2975_v48  ;;  %2988 = verf.f32 %v1525_v61 }
 0x1eb   : > { %v3646_v54 = vadd.f32 %v1333_v62, %v3591_v51  ;;  %v1335_v7 = vpop.f32.mrb[21].mxu0  ;;  %v2979_v56 = vpop.eup %2978  ;;  %v1647_v40 = vadd.f32 1.0, %v2977_v5  ;;  %1977 = vmatprep.mubr.bf16.mxu1 %v1767_v13 }
 0x1ec   : > { %v3650_v47 = vadd.f32 %v1335_v7, %v3595_v53  ;;  %v1337_v58 = vpop.f32.mrb[22].mxu0  ;;  %v2981_v0 = vpop.eup %2980  ;;  %v1648_v43 = vadd.f32 1.0, %v2979_v56  ;;  %1978 = vmatmul.mubr.bf16.gmra.mrb[40].mxu1 %v1766_v2  ;;  %v1710_v48 = vmul.f32 %v1646_v14, %v1454_v10 }
 0x1ed   : > { %v1526_v6 = vmul.f32 0.70710677, %v3646_v54  ;;  %v1339_v12 = vpop.f32.mrb[23].mxu0  ;;  %v1649_v1 = vadd.f32 1.0, %v2981_v0  ;;  %v3656_v63 = vadd.f32 %v1337_v58, %v3591_v51  ;;  %v1711_v8 = vmul.f32 %v1647_v40, %v1455_v4 }
 0x1ee   : > { %v1527_v15 = vmul.f32 0.70710677, %v3650_v47  ;;  %v1712_v61 = vmul.f32 %v1648_v43, %v1456_v9  ;;  %v3659_v5 = vadd.f32 %v1339_v12, %v3595_v53  ;;  %v1458_v40 = vmul.f32 0.5, %v3628_v3 }
 0x1ef   : > { %2990 = verf.f32 %v1526_v6  ;;  %v1713_v57 = vmul.f32 %v1649_v1, %v1457_v60  ;;  %v1528_v62 = vmul.f32 0.70710677, %v3656_v63  ;;  %v1459_v60 = vmul.f32 0.5, %v3632_v11 }
 0x1f0   : > { %2992 = verf.f32 %v1527_v15  ;;  %v1529_v59 = vmul.f32 0.70710677, %v3659_v5  ;;  %v1768_v13 = vpack.c.bf16 %v1712_v61, %v1710_v48  ;;  %v1460_v1 = vmul.f32 0.5, %v3638_v55 }
 0x1f1   : > { %v2983_v2 = vpop.eup %2982  ;;  %2994 = verf.f32 %v1528_v62  ;;  %v1769_v58 = vpack.c.bf16 %v1713_v57, %v1711_v8  ;;  %v1461_v8 = vmul.f32 0.5, %v3641_v46 }
 0x1f2   : > { %v2985_v7 = vpop.eup %2984  ;;  %v1343_v56 = vpop.f32.mrb[24].mxu0  ;;  %v1650_v0 = vadd.f32 1.0, %v2983_v2  ;;  %2996 = verf.f32 %v1529_v59 }
 0x1f3   : > { %v3664_v14 = vadd.f32 %v1343_v56, %v3591_v51  ;;  %v1345_v10 = vpop.f32.mrb[25].mxu0  ;;  %v2987_v9 = vpop.eup %2986  ;;  %v1651_v4 = vadd.f32 1.0, %v2985_v7  ;;  %1985 = vmatprep.mubr.bf16.mxu1 %v1769_v58 }
 0x1f4   : > { %v3668_v43 = vadd.f32 %v1345_v10, %v3595_v53  ;;  %v1347_v6 = vpop.f32.mrb[26].mxu0  ;;  %v2989_v12 = vpop.eup %2988  ;;  %v1652_v15 = vadd.f32 1.0, %v2987_v9  ;;  %1986 = vmatmul.mubr.bf16.gmra.mrb[44].mxu1 %v1768_v13  ;;  %v1714_v2 = vmul.f32 %v1650_v0, %v1458_v40 }
 0x1f5   : > { %v1530_v48 = vmul.f32 0.70710677, %v3664_v14  ;;  %v1349_v61 = vpop.f32.mrb[27].mxu0  ;;  %v1653_v57 = vadd.f32 1.0, %v2989_v12  ;;  %v3676_v62 = vadd.f32 %v1347_v6, %v3591_v51  ;;  %v1715_v55 = vmul.f32 %v1651_v4, %v1459_v60 }
 0x1f6   : > { %v1531_v3 = vmul.f32 0.70710677, %v3668_v43  ;;  %v1716_v59 = vmul.f32 %v1652_v15, %v1460_v1  ;;  %v3679_v11 = vadd.f32 %v1349_v61, %v3595_v53  ;;  %v1171_v4 = vadd.f32 %v3528_v16, %v3591_v51 }
 0x1f7   : > { %2998 = verf.f32 %v1530_v48  ;;  %v1717_v7 = vmul.f32 %v1653_v57, %v1461_v8  ;;  %v1532_v13 = vmul.f32 0.70710677, %v3676_v62  ;;  %v1462_v1 = vmul.f32 0.5, %v3646_v54 }
 0x1f8   : > { %3000 = verf.f32 %v1531_v3  ;;  %v1533_v46 = vmul.f32 0.70710677, %v3679_v11  ;;  %v1770_v58 = vpack.c.bf16 %v1716_v59, %v1714_v2  ;;  %v1173_v8 = vadd.f32 %v3530_v17, %v3595_v53 }
 0x1f9   : > { %v2991_v56 = vpop.eup %2990  ;;  %3002 = verf.f32 %v1532_v13  ;;  %v1771_v6 = vpack.c.bf16 %v1717_v7, %v1715_v55  ;;  %v1463_v3 = vmul.f32 0.5, %v3650_v47  ;;  %v1464_v2 = vmul.f32 0.5, %v3656_v63 }
 0x1fa   : > { %v2993_v10 = vpop.eup %2992  ;;  %v1353_v9 = vpop.f32.mrb[28].mxu0  ;;  %v1654_v12 = vadd.f32 1.0, %v2991_v56  ;;  %3004 = verf.f32 %v1533_v46  ;;  %v1465_v54 = vmul.f32 0.5, %v3659_v5 }
 0x1fb   : > { %v3684_v0 = vadd.f32 %v1353_v9, %v3591_v51  ;;  %v1355_v40 = vpop.f32.mrb[29].mxu0  ;;  %v2995_v60 = vpop.eup %2994  ;;  %v1655_v15 = vadd.f32 1.0, %v2993_v10  ;;  %1993 = vmatprep.mubr.bf16.mxu1 %v1771_v6 }
 0x1fc   : > { %v3690_v48 = vadd.f32 %v1355_v40, %v3595_v53  ;;  %v1357_v61 = vpop.f32.mrb[30].mxu0  ;;  %v2997_v57 = vpop.eup %2996  ;;  %v1656_v59 = vadd.f32 1.0, %v2995_v60  ;;  %1994 = vmatmul.mubr.bf16.gmra.mrb[48].mxu1 %v1770_v58  ;;  %v1718_v46 = vmul.f32 %v1654_v12, %v1462_v1  ;;  %v1175_v60 = vadd.f32 %v3532_v18, %v3591_v51 }
 0x1fd   : > { %v1534_v16 = vmul.f32 0.70710677, %v3684_v0  ;;  %v1359_v55 = vpop.f32.mrb[31].mxu0  ;;  %v1657_v7 = vadd.f32 1.0, %v2997_v57  ;;  %v3700_v56 = vadd.f32 %v1357_v61, %v3591_v51  ;;  %v1719_v63 = vmul.f32 %v1655_v15, %v1463_v3 }
 0x1fe   : > { %v1535_v13 = vmul.f32 0.70710677, %v3690_v48  ;;  %v1720_v17 = vmul.f32 %v1656_v59, %v1464_v2  ;;  %v3703_v47 = vadd.f32 %v1359_v55, %v3595_v53  ;;  %v1177_v12 = vadd.f32 %v3534_v19, %v3595_v53 }
 0x1ff   : > { %3006 = verf.f32 %v1534_v16  ;;  %v1721_v10 = vmul.f32 %v1657_v7, %v1465_v54  ;;  %v1536_v58 = vmul.f32 0.70710677, %v3700_v56  ;;  %v1181_v2 = vadd.f32 %v3536_v20, %v3591_v51 }
 0x200   : > { %3008 = verf.f32 %v1535_v13  ;;  %v1537_v5 = vmul.f32 0.70710677, %v3703_v47  ;;  %v1772_v6 = vpack.c.bf16 %v1720_v17, %v1718_v46  ;;  %v1466_v16 = vmul.f32 0.5, %v3664_v14 }
 0x201   : > { %v2999_v9 = vpop.eup %2998  ;;  %3010 = verf.f32 %v1536_v58  ;;  %v1773_v61 = vpack.c.bf16 %v1721_v10, %v1719_v63  ;;  %v1183_v19 = vadd.f32 %v3538_v21, %v3595_v53  ;;  %v1467_v13 = vmul.f32 0.5, %v3668_v43 }
 0x202   : > { %v3001_v40 = vpop.eup %3000  ;;  %v1363_v1 = vpop.f32.mrb[32].mxu0  ;;  %v1658_v57 = vadd.f32 1.0, %v2999_v9  ;;  %3012 = verf.f32 %v1537_v5  ;;  %v1469_v14 = vmul.f32 0.5, %v3679_v11 }
 0x203   : > { %v3711_v15 = vadd.f32 %v1363_v1, %v1171_v4  ;;  %v1365_v3 = vpop.f32.mrb[33].mxu0  ;;  %v3003_v59 = vpop.eup %3002  ;;  %v1659_v55 = vadd.f32 1.0, %v3001_v40  ;;  %2001 = vmatprep.mubr.bf16.mxu1 %v1773_v61  ;;  %v1468_v4 = vmul.f32 0.5, %v3676_v62  ;;  %v1187_v61 = vadd.f32 %v3542_v23, %v3595_v53 }
 0x204   : > { %v3716_v54 = vadd.f32 %v1365_v3, %v1173_v8  ;;  %v1367_v18 = vpop.f32.mrb[34].mxu0  ;;  %v3005_v7 = vpop.eup %3004  ;;  %v1660_v46 = vadd.f32 1.0, %v3003_v59  ;;  %2002 = vmatmul.mubr.bf16.gmra.mrb[52].mxu1 %v1772_v6  ;;  %v1722_v58 = vmul.f32 %v1658_v57, %v1466_v16  ;;  %v1193_v23 = vadd.f32 %v3546_v25, %v3595_v53 }
 0x205   : > { %v1538_v17 = vmul.f32 0.70710677, %v3711_v15  ;;  %v1369_v20 = vpop.f32.mrb[35].mxu0  ;;  %v1661_v63 = vadd.f32 1.0, %v3005_v7  ;;  %v3725_v10 = vadd.f32 %v1367_v18, %v1175_v60  ;;  %v1723_v43 = vmul.f32 %v1659_v55, %v1467_v13 }
 0x206   : > { %v1539_v8 = vmul.f32 0.70710677, %v3716_v54  ;;  %v1724_v9 = vmul.f32 %v1660_v46, %v1468_v4  ;;  %v3727_v21 = vadd.f32 %v1369_v20, %v1177_v12  ;;  %v1185_v60 = vadd.f32 %v3540_v22, %v3591_v51 }
 0x207   : > { %3014 = verf.f32 %v1538_v17  ;;  %v1725_v5 = vmul.f32 %v1661_v63, %v1469_v14  ;;  %v1540_v62 = vmul.f32 0.70710677, %v3725_v10  ;;  %v1191_v55 = vadd.f32 %v3544_v24, %v3591_v51 }
 0x208   : > { %3016 = verf.f32 %v1539_v8  ;;  %v1541_v6 = vmul.f32 0.70710677, %v3727_v21  ;;  %v1774_v1 = vpack.c.bf16 %v1724_v9, %v1722_v58  ;;  %v1470_v7 = vmul.f32 0.5, %v3684_v0 }
 0x209   : > { %v3007_v40 = vpop.eup %3006  ;;  %3018 = verf.f32 %v1540_v62  ;;  %v1775_v12 = vpack.c.bf16 %v1725_v5, %v1723_v43  ;;  %v1471_v17 = vmul.f32 0.5, %v3690_v48  ;;  %v1473_v0 = vmul.f32 0.5, %v3703_v47 }
 0x20a   : > { %v3009_v11 = vpop.eup %3008  ;;  %v1373_v57 = vpop.f32.mrb[36].mxu0  ;;  %v1662_v3 = vadd.f32 1.0, %v3007_v40  ;;  %3020 = verf.f32 %v1541_v6  ;;  %v1195_v6 = vadd.f32 %v3548_v26, %v3591_v51 }
 0x20b   : > { %v3735_v59 = vadd.f32 %v1373_v57, %v1181_v2  ;;  %v1375_v16 = vpop.f32.mrb[37].mxu0  ;;  %v3011_v18 = vpop.eup %3010  ;;  %v1663_v13 = vadd.f32 1.0, %v3009_v11  ;;  %2009 = vmatprep.mubr.bf16.mxu1 %v1775_v12  ;;  %v1472_v2 = vmul.f32 0.5, %v3700_v56 }
 0x20c   : > { %v3740_v4 = vadd.f32 %v1375_v16, %v1183_v19  ;;  %v1377_v22 = vpop.f32.mrb[38].mxu0  ;;  %v3013_v46 = vpop.eup %3012  ;;  %v1664_v20 = vadd.f32 1.0, %v3011_v18  ;;  %2010 = vmatmul.mubr.bf16.gmra.mrb[56].mxu1 %v1774_v1  ;;  %v1726_v58 = vmul.f32 %v1662_v3, %v1470_v7  ;;  %v1197_v1 = vadd.f32 %v3550_v27, %v3595_v53 }
 0x20d   : > { %v1542_v14 = vmul.f32 0.70710677, %v3735_v59  ;;  %v1379_v24 = vpop.f32.mrb[39].mxu0  ;;  %v1665_v63 = vadd.f32 1.0, %v3013_v46  ;;  %v3749_v8 = vadd.f32 %v1377_v22, %v1185_v60  ;;  %v1727_v48 = vmul.f32 %v1663_v13, %v1471_v17 }
 0x20e   : > { %v1543_v19 = vmul.f32 0.70710677, %v3740_v4  ;;  %v1728_v9 = vmul.f32 %v1664_v20, %v1472_v2  ;;  %v3751_v25 = vadd.f32 %v1379_v24, %v1187_v61  ;;  %v1201_v3 = vadd.f32 %v3552_v28, %v3591_v51 }
 0x20f   : > { %3022 = verf.f32 %v1542_v14  ;;  %v1729_v43 = vmul.f32 %v1665_v63, %v1473_v0  ;;  %v1544_v56 = vmul.f32 0.70710677, %v3749_v8  ;;  %v1474_v18 = vmul.f32 0.5, %v3711_v15 }
 0x210   : > { %3024 = verf.f32 %v1543_v19  ;;  %v1545_v62 = vmul.f32 0.70710677, %v3751_v25  ;;  %v1776_v40 = vpack.c.bf16 %v1728_v9, %v1726_v58  ;;  %v1203_v27 = vadd.f32 %v3554_v29, %v3595_v53 }
 0x211   : > { %v3015_v5 = vpop.eup %3014  ;;  %3026 = verf.f32 %v1544_v56  ;;  %v1777_v60 = vpack.c.bf16 %v1729_v43, %v1727_v48  ;;  %v1475_v46 = vmul.f32 0.5, %v3716_v54  ;;  %v1477_v15 = vmul.f32 0.5, %v3727_v21 }
 0x212   : > { %v3017_v47 = vpop.eup %3016  ;;  %v1383_v11 = vpop.f32.mrb[40].mxu0  ;;  %v1666_v61 = vadd.f32 1.0, %v3015_v5  ;;  %3028 = verf.f32 %v1545_v62  ;;  %v1205_v48 = vadd.f32 %v3556_v30, %v3591_v51  ;;  %v1207_v43 = vadd.f32 %v3558_v31, %v3595_v53 }
 0x213   : > { %v3759_v57 = vadd.f32 %v1383_v11, %v1191_v55  ;;  %v1385_v12 = vpop.f32.mrb[41].mxu0  ;;  %v3019_v16 = vpop.eup %3018  ;;  %v1667_v7 = vadd.f32 1.0, %v3017_v47  ;;  %2017 = vmatprep.mubr.bf16.mxu1 %v1777_v60  ;;  %v1476_v55 = vmul.f32 0.5, %v3725_v10  ;;  %v1478_v11 = vmul.f32 0.5, %v3735_v59 }
 0x214   : > { %v3764_v13 = vadd.f32 %v1385_v12, %v1193_v23  ;;  %v1387_v26 = vpop.f32.mrb[42].mxu0  ;;  %v3021_v22 = vpop.eup %3020  ;;  %v1668_v17 = vadd.f32 1.0, %v3019_v16  ;;  %2018 = vmatmul.mubr.bf16.gmra.mrb[60].mxu1 %v1776_v40  ;;  %v1730_v24 = vmul.f32 %v1666_v61, %v1474_v18  ;;  %v1213_v31 = vadd.f32 %v3562_v33, %v3595_v53 }
 0x215   : > { %v1546_v2 = vmul.f32 0.70710677, %v3759_v57  ;;  %v1389_v28 = vpop.f32.mrb[43].mxu0  ;;  %v1669_v20 = vadd.f32 1.0, %v3021_v22  ;;  %v3773_v14 = vadd.f32 %v1387_v26, %v1195_v6  ;;  %v1731_v54 = vmul.f32 %v1667_v7, %v1475_v46 }
 0x216   : > { %v1547_v23 = vmul.f32 0.70710677, %v3764_v13  ;;  %v1732_v0 = vmul.f32 %v1668_v17, %v1476_v55  ;;  %v3775_v29 = vadd.f32 %v1389_v28, %v1197_v1  ;;  %v1211_v6 = vadd.f32 %v3560_v32, %v3591_v51 }
 0x217   : > { %3030 = verf.f32 %v1546_v2  ;;  %v1733_v63 = vmul.f32 %v1669_v20, %v1477_v15  ;;  %v1548_v10 = vmul.f32 0.70710677, %v3773_v14  ;;  %v1479_v16 = vmul.f32 0.5, %v3740_v4 }
 0x218   : > { %3032 = verf.f32 %v1547_v23  ;;  %v1549_v58 = vmul.f32 0.70710677, %v3775_v29  ;;  %v1778_v9 = vpack.c.bf16 %v1732_v0, %v1730_v24  ;;  %v1481_v59 = vmul.f32 0.5, %v3751_v25 }
 0x219   : > { %v3023_v19 = vpop.eup %3022  ;;  %3034 = verf.f32 %v1548_v10  ;;  %v1779_v5 = vpack.c.bf16 %v1733_v63, %v1731_v54  ;;  %v1215_v20 = vadd.f32 %v3564_v34, %v3591_v51  ;;  %v1217_v23 = vadd.f32 %v3566_v35, %v3595_v53 }
 0x21a   : > { %v3025_v21 = vpop.eup %3024  ;;  %v1393_v56 = vpop.f32.mrb[44].mxu0  ;;  %v1670_v62 = vadd.f32 1.0, %v3023_v19  ;;  %3036 = verf.f32 %v1549_v58  ;;  %v1221_v19 = vadd.f32 %v3568_v36, %v3591_v51  ;;  %v1223_v35 = vadd.f32 %v3570_v37, %v3595_v53 }
 0x21b   : > { %v3783_v40 = vadd.f32 %v1393_v56, %v1201_v3  ;;  %v1395_v47 = vpop.f32.mrb[45].mxu0  ;;  %v3027_v1 = vpop.eup %3026  ;;  %v1671_v60 = vadd.f32 1.0, %v3025_v21  ;;  %2025 = vmatprep.mubr.bf16.mxu1 %v1779_v5  ;;  %v1480_v3 = vmul.f32 0.5, %v3749_v8  ;;  %v1483_v56 = vmul.f32 0.5, %v3764_v13 }
 0x21c   : > { %v3788_v61 = vadd.f32 %v1395_v47, %v1203_v27  ;;  %v1397_v30 = vpop.f32.mrb[46].mxu0  ;;  %v3029_v12 = vpop.eup %3028  ;;  %v1672_v18 = vadd.f32 1.0, %v3027_v1  ;;  %2026 = vmatmul.mubr.bf16.gmra.mrb[64].mxu1 %v1778_v9  ;;  %v1734_v46 = vmul.f32 %v1670_v62, %v1478_v11  ;;  %v1482_v9 = vmul.f32 0.5, %v3759_v57 }
 0x21d   : > { %v1550_v7 = vmul.f32 0.70710677, %v3783_v40  ;;  %v1399_v32 = vpop.f32.mrb[47].mxu0  ;;  %v1673_v26 = vadd.f32 1.0, %v3029_v12  ;;  %v3797_v22 = vadd.f32 %v1397_v30, %v1205_v48  ;;  %v1735_v4 = vmul.f32 %v1671_v60, %v1479_v16 }
 0x21e   : > { %v1551_v27 = vmul.f32 0.70710677, %v3788_v61  ;;  %v1736_v55 = vmul.f32 %v1672_v18, %v1480_v3  ;;  %v3799_v33 = vadd.f32 %v1399_v32, %v1207_v43  ;;  %v1484_v5 = vmul.f32 0.5, %v3773_v14 }
 0x21f   : > { %3038 = verf.f32 %v1550_v7  ;;  %v1737_v17 = vmul.f32 %v1673_v26, %v1481_v59  ;;  %v1552_v8 = vmul.f32 0.70710677, %v3797_v22  ;;  %v1485_v57 = vmul.f32 0.5, %v3775_v29 }
 0x220   : > { %3040 = verf.f32 %v1551_v27  ;;  %v1553_v28 = vmul.f32 0.70710677, %v3799_v33  ;;  %v1780_v15 = vpack.c.bf16 %v1736_v55, %v1734_v46  ;;  %v1225_v18 = vadd.f32 %v3572_v38, %v3591_v51 }
 0x221   : > { %v3031_v2 = vpop.eup %3030  ;;  %3042 = verf.f32 %v1552_v8  ;;  %v1781_v0 = vpack.c.bf16 %v1737_v17, %v1735_v4  ;;  %v1227_v7 = vadd.f32 %v3574_v39, %v3595_v53  ;;  %v1231_v55 = vadd.f32 %v3576_v41, %v3591_v51 }
 0x222   : > { %v3033_v25 = vpop.eup %3032  ;;  %v1403_v24 = vpop.f32.mrb[48].mxu0  ;;  %v1674_v54 = vadd.f32 1.0, %v3031_v2  ;;  %3044 = verf.f32 %v1553_v28  ;;  %v1486_v17 = vmul.f32 0.5, %v3783_v40  ;;  %v1233_v39 = vadd.f32 %v3578_v42, %v3595_v53 }
 0x223   : > { %v3807_v63 = vadd.f32 %v1403_v24, %v1211_v6  ;;  %v1405_v10 = vpop.f32.mrb[49].mxu0  ;;  %v3035_v58 = vpop.eup %3034  ;;  %v1675_v21 = vadd.f32 1.0, %v3033_v25  ;;  %2033 = vmatprep.mubr.bf16.mxu1 %v1781_v0  ;;  %v1488_v25 = vmul.f32 0.5, %v3797_v22  ;;  %v1489_v40 = vmul.f32 0.5, %v3799_v33 }
 0x224   : > { %v3812_v48 = vadd.f32 %v1405_v10, %v1213_v31  ;;  %v1407_v34 = vpop.f32.mrb[50].mxu0  ;;  %v3037_v43 = vpop.eup %3036  ;;  %v1676_v62 = vadd.f32 1.0, %v3035_v58  ;;  %2034 = vmatmul.mubr.bf16.gmra.mrb[68].mxu1 %v1780_v15  ;;  %v1738_v60 = vmul.f32 %v1674_v54, %v1482_v9  ;;  %v1487_v15 = vmul.f32 0.5, %v3788_v61 }
 0x225   : > { %v1554_v47 = vmul.f32 0.70710677, %v3807_v63  ;;  %v1409_v36 = vpop.f32.mrb[51].mxu0  ;;  %v1677_v6 = vadd.f32 1.0, %v3037_v43  ;;  %v3821_v11 = vadd.f32 %v1407_v34, %v1215_v20  ;;  %v1739_v13 = vmul.f32 %v1675_v21, %v1483_v56 }
 0x226   : > { %v1555_v1 = vmul.f32 0.70710677, %v3812_v48  ;;  %v1740_v30 = vmul.f32 %v1676_v62, %v1484_v5  ;;  %v3823_v37 = vadd.f32 %v1409_v36, %v1217_v23  ;;  %v1237_v43 = vadd.f32 %v3582_v45, %v3595_v53 }
 0x227   : > { %3046 = verf.f32 %v1554_v47  ;;  %v1741_v31 = vmul.f32 %v1677_v6, %v1485_v57  ;;  %v1556_v14 = vmul.f32 0.70710677, %v3821_v11  ;;  %v1241_v57 = vadd.f32 %v3587_v49, %v3591_v51 }
 0x228   : > { %3048 = verf.f32 %v1555_v1  ;;  %v1557_v16 = vmul.f32 0.70710677, %v3823_v37  ;;  %v1782_v3 = vpack.c.bf16 %v1740_v30, %v1738_v60  ;;  %v1490_v1 = vmul.f32 0.5, %v3807_v63 }
 0x229   : > { %v3039_v12 = vpop.eup %3038  ;;  %3050 = verf.f32 %v1556_v14  ;;  %v1783_v59 = vpack.c.bf16 %v1741_v31, %v1739_v13  ;;  %v1243_v45 = vadd.f32 %v3589_v50, %v3595_v53  ;;  %v1491_v31 = vmul.f32 0.5, %v3812_v48 }
 0x22a   : > { %v3041_v29 = vpop.eup %3040  ;;  %v1413_v32 = vpop.f32.mrb[52].mxu0  ;;  %v1678_v26 = vadd.f32 1.0, %v3039_v12  ;;  %3052 = verf.f32 %v1557_v16  ;;  %v1492_v14 = vmul.f32 0.5, %v3821_v11  ;;  %v1493_v63 = vmul.f32 0.5, %v3823_v37 }
 0x22b   : > { %v3831_v27 = vadd.f32 %v1413_v32, %v1221_v19  ;;  %v1415_v46 = vpop.f32.mrb[53].mxu0  ;;  %v3043_v4 = vpop.eup %3042  ;;  %v1679_v8 = vadd.f32 1.0, %v3041_v29  ;;  %2041 = vmatprep.mubr.bf16.mxu1 %v1783_v59 }
 0x22c   : > { %v3836_v2 = vadd.f32 %v1415_v46, %v1223_v35  ;;  %v1417_v38 = vpop.f32.mrb[54].mxu0  ;;  %v3045_v28 = vpop.eup %3044  ;;  %v1680_v20 = vadd.f32 1.0, %v3043_v4  ;;  %2042 = vmatmul.mubr.bf16.gmra.mrb[72].mxu1 %v1782_v3  ;;  %v1742_v10 = vmul.f32 %v1678_v26, %v1486_v17  ;;  %v1235_v35 = vadd.f32 %v3580_v44, %v3591_v51 }
 0x22d   : > { %v1558_v23 = vmul.f32 0.70710677, %v3831_v27  ;;  %v1419_v41 = vpop.f32.mrb[55].mxu0  ;;  %v1681_v24 = vadd.f32 1.0, %v3045_v28  ;;  %v3845_v54 = vadd.f32 %v1417_v38, %v1225_v18  ;;  %v1743_v61 = vmul.f32 %v1679_v8, %v1487_v15 }
 0x22e   : > { %v1559_v0 = vmul.f32 0.70710677, %v3836_v2  ;;  %v1744_v19 = vmul.f32 %v1680_v20, %v1488_v25  ;;  %v3847_v42 = vadd.f32 %v1419_v41, %v1227_v7  ;;  %v1245_v38 = vadd.f32 %v3593_v52, %v3591_v51 }
 0x22f   : > { %3054 = verf.f32 %v1558_v23  ;;  %v1745_v58 = vmul.f32 %v1681_v24, %v1489_v40  ;;  %v1560_v22 = vmul.f32 0.70710677, %v3845_v54  ;;  %v1494_v25 = vmul.f32 0.5, %v3831_v27  ;;  %v4022_v23 = vld [vmem:[#allocation12_spill] sm:$0xff] }
 0x230   : > { %3056 = verf.f32 %v1559_v0  ;;  %v1561_v21 = vmul.f32 0.70710677, %v3847_v42  ;;  %v1784_v34 = vpack.c.bf16 %v1744_v19, %v1742_v10  ;;  %v1247_v41 = vadd.f32 %v4022_v23, %v3595_v53 }
 0x231   : > { %v3047_v9 = vpop.eup %3046  ;;  %3058 = verf.f32 %v1560_v22  ;;  %v1785_v5 = vpack.c.bf16 %v1745_v58, %v1743_v61  ;;  %v1495_v10 = vmul.f32 0.5, %v3836_v2  ;;  %v1496_v19 = vmul.f32 0.5, %v3845_v54 }
 0x232   : > { %v3049_v33 = vpop.eup %3048  ;;  %v1423_v56 = vpop.f32.mrb[56].mxu0  ;;  %v1682_v62 = vadd.f32 1.0, %v3047_v9  ;;  %3060 = verf.f32 %v1561_v21  ;;  %v1497_v52 = vmul.f32 0.5, %v3847_v42 }
 0x233   : > { %v3855_v47 = vadd.f32 %v1423_v56, %v1231_v55  ;;  %v1425_v36 = vpop.f32.mrb[57].mxu0  ;;  %v3051_v6 = vpop.eup %3050  ;;  %v1683_v60 = vadd.f32 1.0, %v3049_v33  ;;  %2049 = vmatprep.mubr.bf16.mxu1 %v1785_v5 }
 0x234   : > { %v3860_v30 = vadd.f32 %v1425_v36, %v1233_v39  ;;  %v1427_v44 = vpop.f32.mrb[58].mxu0  ;;  %v3053_v13 = vpop.eup %3052  ;;  %v1684_v12 = vadd.f32 1.0, %v3051_v6  ;;  %2050 = vmatmul.mubr.bf16.gmra.mrb[76].mxu1 %v1784_v34  ;;  %v1746_v7 = vmul.f32 %v1682_v62, %v1490_v1 }
 0x235   : > { %v1562_v16 = vmul.f32 0.70710677, %v3855_v47  ;;  %v1429_v49 = vpop.f32.mrb[59].mxu0  ;;  %v1685_v3 = vadd.f32 1.0, %v3053_v13  ;;  %v1428_v18 = vadd.f32 %v1427_v44, %v1235_v35  ;;  %v1747_v59 = vmul.f32 %v1683_v60, %v1491_v31 }
 0x236   : > { %v1563_v29 = vmul.f32 0.70710677, %v3860_v30  ;;  %v1748_v32 = vmul.f32 %v1684_v12, %v1492_v14  ;;  %v1430_v50 = vadd.f32 %v1429_v49, %v1237_v43  ;;  %v1498_v1 = vmul.f32 0.5, %v3855_v47 }
 0x237   : > { %3062 = verf.f32 %v1562_v16  ;;  %v1749_v26 = vmul.f32 %v1685_v3, %v1493_v63  ;;  %v1564_v48 = vmul.f32 0.70710677, %v1428_v18  ;;  %v1500_v60 = vmul.f32 0.5, %v1428_v18 }
 0x238   : > { %3064 = verf.f32 %v1563_v29  ;;  %v1565_v46 = vmul.f32 0.70710677, %v1430_v50  ;;  %v1786_v55 = vpack.c.bf16 %v1748_v32, %v1746_v7  ;;  %v1501_v13 = vmul.f32 0.5, %v1430_v50 }
 0x239   : > { %v3055_v11 = vpop.eup %3054  ;;  %3066 = verf.f32 %v1564_v48  ;;  %v1787_v8 = vpack.c.bf16 %v1749_v26, %v1747_v59 }
 0x23a   : > { %v3057_v4 = vpop.eup %3056  ;;  %v1433_v17 = vpop.f32.mrb[60].mxu0  ;;  %v1686_v37 = vadd.f32 1.0, %v3055_v11  ;;  %3068 = verf.f32 %v1565_v46 }
 0x23b   : > { %v1434_v39 = vadd.f32 %v1433_v17, %v1241_v57  ;;  %v1435_v28 = vpop.f32.mrb[61].mxu0  ;;  %v3059_v15 = vpop.eup %3058  ;;  %v1687_v20 = vadd.f32 1.0, %v3057_v4  ;;  %2057 = vmatprep.mubr.bf16.mxu1 %v1787_v8 }
 0x23c   : > { %v1436_v40 = vadd.f32 %v1435_v28, %v1243_v45  ;;  %v1437_v24 = vpop.f32.mrb[62].mxu0  ;;  %v3061_v0 = vpop.eup %3060  ;;  %v1688_v61 = vadd.f32 1.0, %v3059_v15  ;;  %2058 = vmatmul.mubr.bf16.gmra.mrb[80].mxu1 %v1786_v55  ;;  %v1750_v21 = vmul.f32 %v1686_v37, %v1494_v25  ;;  %v1499_v45 = vmul.f32 0.5, %v3860_v30 }
 0x23d   : > { %v1566_v58 = vmul.f32 0.70710677, %v1434_v39  ;;  %v1439_v51 = vpop.f32.mrb[63].mxu0  ;;  %v1689_v22 = vadd.f32 1.0, %v3061_v0  ;;  %v1438_v9 = vadd.f32 %v1437_v24, %v1245_v38  ;;  %v1751_v33 = vmul.f32 %v1687_v20, %v1495_v10 }
 0x23e   : > { %v1567_v27 = vmul.f32 0.70710677, %v1436_v40  ;;  %v1752_v34 = vmul.f32 %v1688_v61, %v1496_v19  ;;  %v1440_v53 = vadd.f32 %v1439_v51, %v1247_v41  ;;  %v1502_v18 = vmul.f32 0.5, %v1434_v39  ;;  %v3883_v39 = vld [vmem:[%s4006_s4] ss:$0 sm:$0xff] }
 0x23f   : > { %3070 = verf.f32 %v1566_v58  ;;  %v1753_v35 = vmul.f32 %v1689_v22, %v1497_v52  ;;  %v1568_v43 = vmul.f32 0.70710677, %v1438_v9  ;;  %v1504_v48 = vmul.f32 0.5, %v1438_v9 }
 0x240   : > { %3072 = verf.f32 %v1567_v27  ;;  %v1569_v56 = vmul.f32 0.70710677, %v1440_v53  ;;  %v1788_v54 = vpack.c.bf16 %v1752_v34, %v1750_v21  ;;  %v1503_v30 = vmul.f32 0.5, %v1436_v40 }
 0x241   : > { %v3063_v2 = vpop.eup %3062  ;;  %3074 = verf.f32 %v1568_v43  ;;  %v1789_v62 = vpack.c.bf16 %v1753_v35, %v1751_v33  ;;  %v1505_v50 = vmul.f32 0.5, %v1440_v53 }
 0x242   : > { %v3065_v5 = vpop.eup %3064  ;;  %v1690_v36 = vadd.f32 1.0, %v3063_v2  ;;  %3076 = verf.f32 %v1569_v56 }
 0x243   : > { %v3067_v42 = vpop.eup %3066  ;;  %v1691_v57 = vadd.f32 1.0, %v3065_v5  ;;  %2065 = vmatprep.mubr.bf16.mxu1 %v1789_v62 }
 0x244   : > { %v3069_v6 = vpop.eup %3068  ;;  %v1692_v44 = vadd.f32 1.0, %v3067_v42  ;;  %2066 = vmatmul.mubr.bf16.gmra.mrb[84].mxu1 %v1788_v54  ;;  %v1754_v14 = vmul.f32 %v1690_v36, %v1498_v1 }
 0x245   : > { %v1693_v31 = vadd.f32 1.0, %v3069_v6  ;;  %v1755_v16 = vmul.f32 %v1691_v57, %v1499_v45 }
 0x246   : > { %v1756_v12 = vmul.f32 %v1692_v44, %v1500_v60 }
 0x247   : > { %v1757_v49 = vmul.f32 %v1693_v31, %v1501_v13 }
 0x248   : > { %v1790_v3 = vpack.c.bf16 %v1756_v12, %v1754_v14 }
 0x249   : > { %v3071_v63 = vpop.eup %3070  ;;  %v1791_v7 = vpack.c.bf16 %v1757_v49, %v1755_v16 }
 0x24a   : > { %v3073_v29 = vpop.eup %3072  ;;  %v1694_v32 = vadd.f32 1.0, %v3071_v63 }
 0x24b   : > { %v3075_v59 = vpop.eup %3074  ;;  %v1695_v26 = vadd.f32 1.0, %v3073_v29  ;;  %2073 = vmatprep.mubr.bf16.mxu1 %v1791_v7 }
 0x24c   : > { %v3077_v47 = vpop.eup %3076  ;;  %v1696_v11 = vadd.f32 1.0, %v3075_v59  ;;  %2074 = vmatmul.mubr.bf16.gmra.mrb[88].mxu1 %v1790_v3  ;;  %v1758_v55 = vmul.f32 %v1694_v32, %v1502_v18 }
 0x24d   : > { %v1697_v46 = vadd.f32 1.0, %v3077_v47  ;;  %v1759_v17 = vmul.f32 %v1695_v26, %v1503_v30 }
 0x24e   : > { %v1760_v4 = vmul.f32 %v1696_v11, %v1504_v48 }
 0x24f   : > { %v1761_v8 = vmul.f32 %v1697_v46, %v1505_v50 }
 0x250   : > { %v1792_v37 = vpack.c.bf16 %v1760_v4, %v1758_v55 }
 0x251   : > { %v1793_v38 = vpack.c.bf16 %v1761_v8, %v1759_v17 }
 0x253   : > { %2081 = vmatprep.mubr.bf16.mxu1 %v1793_v38 }
 0x254   : > { %2082 = vmatmul.mubr.bf16.gmra.mrb[92].mxu1 %v1792_v37 }
 0x2af   : > { %v2411_v28 = vpop.f32.mrb[32].mxu1 }
 0x2b0   : > { %v2412_v15 = vpop.f32.mrb[33].mxu1 }
 0x2b1   : > { %v2413_v25 = vadd.f32 %v2412_v15, %v2411_v28  ;;  %v2414_v20 = vpop.f32.mrb[34].mxu1 }
 0x2b2   : > { %v2415_v23 = vpop.f32.mrb[35].mxu1 }
 0x2b3   : > { %v1964_v41 = vadd.f32 %v2413_v25, %v3883_v39  ;;  %v2416_v40 = vadd.f32 %v2415_v23, %v2414_v20 }
 0x2b5   : > { %2090 = vst [vmem:[%s3886_s13] sm:$0xff] %v1964_v41  ;;  %v1967_v24 = vadd.f32 %v2416_v40, %v3883_v39 }
 0x2b7   : > { %2091 = vst [vmem:[%s3886_s13 + $0x8] sm:$0xff] %v1967_v24  ;;  %v2417_v0 = vpop.f32.mrb[36].mxu1 }
 0x2b8   : > { %v2418_v10 = vpop.f32.mrb[37].mxu1 }
 0x2b9   : > { %v2419_v19 = vadd.f32 %v2418_v10, %v2417_v0  ;;  %v2420_v61 = vpop.f32.mrb[38].mxu1 }
 0x2ba   : > { %v2421_v58 = vpop.f32.mrb[39].mxu1 }
 0x2bb   : > { %v1972_v51 = vadd.f32 %v2419_v19, %v3883_v39  ;;  %v2422_v52 = vadd.f32 %v2421_v58, %v2420_v61 }
 0x2bd   : > { %2092 = vst [vmem:[%s3886_s13 + $0x10] sm:$0xff] %v1972_v51  ;;  %v1975_v22 = vadd.f32 %v2422_v52, %v3883_v39 }
 0x2bf   : > { %2093 = vst [vmem:[%s3886_s13 + $0x18] sm:$0xff] %v1975_v22  ;;  %v2423_v27 = vpop.f32.mrb[40].mxu1 }
 0x2c0   : > { %v2424_v9 = vpop.f32.mrb[41].mxu1 }
 0x2c1   : > { %v2425_v21 = vadd.f32 %v2424_v9, %v2423_v27  ;;  %v2426_v34 = vpop.f32.mrb[42].mxu1 }
 0x2c2   : > { %v2427_v53 = vpop.f32.mrb[43].mxu1 }
 0x2c3   : > { %v1980_v33 = vadd.f32 %v2425_v21, %v3883_v39  ;;  %v2428_v35 = vadd.f32 %v2427_v53, %v2426_v34 }
 0x2c5   : > { %2094 = vst [vmem:[%s3886_s13 + $0x20] sm:$0xff] %v1980_v33  ;;  %v1983_v43 = vadd.f32 %v2428_v35, %v3883_v39 }
 0x2c7   : > { %2095 = vst [vmem:[%s3886_s13 + $0x28] sm:$0xff] %v1983_v43  ;;  %v2429_v2 = vpop.f32.mrb[44].mxu1 }
 0x2c8   : > { %v2430_v56 = vpop.f32.mrb[45].mxu1 }
 0x2c9   : > { %v2431_v54 = vadd.f32 %v2430_v56, %v2429_v2  ;;  %v2432_v5 = vpop.f32.mrb[46].mxu1 }
 0x2ca   : > { %v2433_v62 = vpop.f32.mrb[47].mxu1 }
 0x2cb   : > { %v1988_v36 = vadd.f32 %v2431_v54, %v3883_v39  ;;  %v2434_v42 = vadd.f32 %v2433_v62, %v2432_v5 }
 0x2cd   : > { %2096 = vst [vmem:[%s3886_s13 + $0x30] sm:$0xff] %v1988_v36  ;;  %v1991_v57 = vadd.f32 %v2434_v42, %v3883_v39 }
 0x2cf   : > { %2097 = vst [vmem:[%s3886_s13 + $0x38] sm:$0xff] %v1991_v57  ;;  %v2435_v6 = vpop.f32.mrb[48].mxu1 }
 0x2d0   : > { %v2436_v1 = vpop.f32.mrb[49].mxu1 }
 0x2d1   : > { %v2437_v60 = vadd.f32 %v2436_v1, %v2435_v6  ;;  %v2438_v44 = vpop.f32.mrb[50].mxu1 }
 0x2d2   : > { %v2439_v45 = vpop.f32.mrb[51].mxu1 }
 0x2d3   : > { %v1996_v13 = vadd.f32 %v2437_v60, %v3883_v39  ;;  %v2440_v31 = vadd.f32 %v2439_v45, %v2438_v44 }
 0x2d5   : > { %2098 = vst [vmem:[%s3886_s13 + $0x40] sm:$0xff] %v1996_v13  ;;  %v1999_v14 = vadd.f32 %v2440_v31, %v3883_v39 }
 0x2d7   : > { %2099 = vst [vmem:[%s3886_s13 + $0x48] sm:$0xff] %v1999_v14  ;;  %v2441_v12 = vpop.f32.mrb[52].mxu1 }
 0x2d8   : > { %v2442_v16 = vpop.f32.mrb[53].mxu1 }
 0x2d9   : > { %v2443_v49 = vadd.f32 %v2442_v16, %v2441_v12  ;;  %v2444_v63 = vpop.f32.mrb[54].mxu1 }
 0x2da   : > { %v2445_v3 = vpop.f32.mrb[55].mxu1 }
 0x2db   : > { %v2004_v29 = vadd.f32 %v2443_v49, %v3883_v39  ;;  %v2446_v7 = vadd.f32 %v2445_v3, %v2444_v63 }
 0x2dd   : > { %2100 = vst [vmem:[%s3886_s13 + $0x50] sm:$0xff] %v2004_v29  ;;  %v2007_v32 = vadd.f32 %v2446_v7, %v3883_v39 }
 0x2df   : > { %2101 = vst [vmem:[%s3886_s13 + $0x58] sm:$0xff] %v2007_v32  ;;  %v2447_v59 = vpop.f32.mrb[56].mxu1 }
 0x2e0   : > { %v2448_v26 = vpop.f32.mrb[57].mxu1 }
 0x2e1   : > { %v2449_v47 = vadd.f32 %v2448_v26, %v2447_v59  ;;  %v2450_v18 = vpop.f32.mrb[58].mxu1 }
 0x2e2   : > { %v2451_v48 = vpop.f32.mrb[59].mxu1 }
 0x2e3   : > { %v2012_v11 = vadd.f32 %v2449_v47, %v3883_v39  ;;  %v2452_v30 = vadd.f32 %v2451_v48, %v2450_v18 }
 0x2e5   : > { %2102 = vst [vmem:[%s3886_s13 + $0x60] sm:$0xff] %v2012_v11  ;;  %v2015_v50 = vadd.f32 %v2452_v30, %v3883_v39 }
 0x2e7   : > { %2103 = vst [vmem:[%s3886_s13 + $0x68] sm:$0xff] %v2015_v50  ;;  %v2453_v46 = vpop.f32.mrb[60].mxu1 }
 0x2e8   : > { %v2454_v55 = vpop.f32.mrb[61].mxu1 }
 0x2e9   : > { %v2455_v4 = vadd.f32 %v2454_v55, %v2453_v46  ;;  %v2456_v17 = vpop.f32.mrb[62].mxu1 }
 0x2ea   : > { %v2457_v8 = vpop.f32.mrb[63].mxu1 }
 0x2eb   : > { %v2020_v37 = vadd.f32 %v2455_v4, %v3883_v39  ;;  %v2458_v38 = vadd.f32 %v2457_v8, %v2456_v17 }
 0x2ed   : > { %2104 = vst [vmem:[%s3886_s13 + $0x70] sm:$0xff] %v2020_v37  ;;  %v2023_v28 = vadd.f32 %v2458_v38, %v3883_v39 }
 0x2ef   : > { %2105 = vst [vmem:[%s3886_s13 + $0x78] sm:$0xff] %v2023_v28  ;;  %v2459_v15 = vpop.f32.mrb[64].mxu1 }
 0x2f0   : > { %v2460_v25 = vpop.f32.mrb[65].mxu1 }
 0x2f1   : > { %v2461_v20 = vadd.f32 %v2460_v25, %v2459_v15  ;;  %v2462_v23 = vpop.f32.mrb[66].mxu1 }
 0x2f2   : > { %v2463_v41 = vpop.f32.mrb[67].mxu1 }
 0x2f3   : > { %v2028_v40 = vadd.f32 %v2461_v20, %v3883_v39  ;;  %v2464_v24 = vadd.f32 %v2463_v41, %v2462_v23 }
 0x2f5   : > { %2106 = vst [vmem:[%s3886_s13 + $0x80] sm:$0xff] %v2028_v40  ;;  %v2031_v0 = vadd.f32 %v2464_v24, %v3883_v39 }
 0x2f7   : > { %2107 = vst [vmem:[%s3886_s13 + $0x88] sm:$0xff] %v2031_v0  ;;  %v2465_v10 = vpop.f32.mrb[68].mxu1 }
 0x2f8   : > { %v2466_v19 = vpop.f32.mrb[69].mxu1 }
 0x2f9   : > { %v2467_v61 = vadd.f32 %v2466_v19, %v2465_v10  ;;  %v2468_v58 = vpop.f32.mrb[70].mxu1 }
 0x2fa   : > { %v2469_v51 = vpop.f32.mrb[71].mxu1 }
 0x2fb   : > { %v2036_v52 = vadd.f32 %v2467_v61, %v3883_v39  ;;  %v2470_v22 = vadd.f32 %v2469_v51, %v2468_v58 }
 0x2fd   : > { %2108 = vst [vmem:[%s3886_s13 + $0x90] sm:$0xff] %v2036_v52  ;;  %v2039_v27 = vadd.f32 %v2470_v22, %v3883_v39 }
 0x2ff   : > { %2109 = vst [vmem:[%s3886_s13 + $0x98] sm:$0xff] %v2039_v27  ;;  %v2471_v9 = vpop.f32.mrb[72].mxu1 }
 0x300   : > { %v2472_v21 = vpop.f32.mrb[73].mxu1 }
 0x301   : > { %v2473_v34 = vadd.f32 %v2472_v21, %v2471_v9  ;;  %v2474_v53 = vpop.f32.mrb[74].mxu1 }
 0x302   : > { %v2475_v33 = vpop.f32.mrb[75].mxu1 }
 0x303   : > { %v2044_v35 = vadd.f32 %v2473_v34, %v3883_v39  ;;  %v2476_v43 = vadd.f32 %v2475_v33, %v2474_v53 }
 0x305   : > { %2110 = vst [vmem:[%s3886_s13 + $0xa0] sm:$0xff] %v2044_v35  ;;  %v2047_v2 = vadd.f32 %v2476_v43, %v3883_v39 }
 0x307   : > { %2111 = vst [vmem:[%s3886_s13 + $0xa8] sm:$0xff] %v2047_v2  ;;  %v2477_v56 = vpop.f32.mrb[76].mxu1 }
 0x308   : > { %v2478_v54 = vpop.f32.mrb[77].mxu1 }
 0x309   : > { %v2479_v5 = vadd.f32 %v2478_v54, %v2477_v56  ;;  %v2480_v62 = vpop.f32.mrb[78].mxu1 }
 0x30a   : > { %v2481_v36 = vpop.f32.mrb[79].mxu1 }
 0x30b   : > { %v2052_v42 = vadd.f32 %v2479_v5, %v3883_v39  ;;  %v2482_v57 = vadd.f32 %v2481_v36, %v2480_v62 }
 0x30d   : > { %2112 = vst [vmem:[%s3886_s13 + $0xb0] sm:$0xff] %v2052_v42  ;;  %v2055_v6 = vadd.f32 %v2482_v57, %v3883_v39 }
 0x30f   : > { %2113 = vst [vmem:[%s3886_s13 + $0xb8] sm:$0xff] %v2055_v6  ;;  %v2483_v1 = vpop.f32.mrb[80].mxu1 }
 0x310   : > { %v2484_v60 = vpop.f32.mrb[81].mxu1 }
 0x311   : > { %v2485_v44 = vadd.f32 %v2484_v60, %v2483_v1  ;;  %v2486_v45 = vpop.f32.mrb[82].mxu1 }
 0x312   : > { %v2487_v13 = vpop.f32.mrb[83].mxu1 }
 0x313   : > { %v2060_v31 = vadd.f32 %v2485_v44, %v3883_v39  ;;  %v2488_v14 = vadd.f32 %v2487_v13, %v2486_v45 }
 0x315   : > { %2114 = vst [vmem:[%s3886_s13 + $0xc0] sm:$0xff] %v2060_v31  ;;  %v2063_v12 = vadd.f32 %v2488_v14, %v3883_v39 }
 0x317   : > { %2115 = vst [vmem:[%s3886_s13 + $0xc8] sm:$0xff] %v2063_v12  ;;  %v2489_v16 = vpop.f32.mrb[84].mxu1 }
 0x318   : > { %v2490_v49 = vpop.f32.mrb[85].mxu1 }
 0x319   : > { %v2491_v63 = vadd.f32 %v2490_v49, %v2489_v16  ;;  %v2492_v3 = vpop.f32.mrb[86].mxu1 }
 0x31a   : > { %v2493_v29 = vpop.f32.mrb[87].mxu1 }
 0x31b   : > { %v2068_v7 = vadd.f32 %v2491_v63, %v3883_v39  ;;  %v2494_v32 = vadd.f32 %v2493_v29, %v2492_v3 }
 0x31d   : > { %2116 = vst [vmem:[%s3886_s13 + $0xd0] sm:$0xff] %v2068_v7  ;;  %v2071_v59 = vadd.f32 %v2494_v32, %v3883_v39 }
 0x31f   : > { %2117 = vst [vmem:[%s3886_s13 + $0xd8] sm:$0xff] %v2071_v59  ;;  %v2495_v26 = vpop.f32.mrb[88].mxu1 }
 0x320   : > { %v2496_v47 = vpop.f32.mrb[89].mxu1 }
 0x321   : > { %v2497_v18 = vadd.f32 %v2496_v47, %v2495_v26  ;;  %v2498_v48 = vpop.f32.mrb[90].mxu1 }
 0x322   : > { %v2499_v11 = vpop.f32.mrb[91].mxu1 }
 0x323   : > { %v2076_v30 = vadd.f32 %v2497_v18, %v3883_v39  ;;  %v2500_v50 = vadd.f32 %v2499_v11, %v2498_v48 }
 0x325   : > { %2118 = vst [vmem:[%s3886_s13 + $0xe0] sm:$0xff] %v2076_v30  ;;  %v2079_v46 = vadd.f32 %v2500_v50, %v3883_v39 }
 0x327   : > { %2119 = vst [vmem:[%s3886_s13 + $0xe8] sm:$0xff] %v2079_v46  ;;  %v2501_v55 = vpop.f32.mrb[92].mxu1 }
 0x328   : > { %v2502_v4 = vpop.f32.mrb[93].mxu1 }
 0x329   : > { %v2503_v17 = vadd.f32 %v2502_v4, %v2501_v55  ;;  %v2504_v8 = vpop.f32.mrb[94].mxu1 }
 0x32a   : > { %v2505_v37 = vpop.f32.mrb[95].mxu1 }
 0x32b   : > { %v2084_v38 = vadd.f32 %v2503_v17, %v3883_v39  ;;  %v2506_v28 = vadd.f32 %v2505_v37, %v2504_v8 }
 0x32d   : > { %2120 = vst [vmem:[%s3886_s13 + $0xf0] sm:$0xff] %v2084_v38  ;;  %v2087_v15 = vadd.f32 %v2506_v28, %v3883_v39 }
 0x32f   : > { %2121 = vst [vmem:[%s3886_s13 + $0xf8] sm:$0xff] %v2087_v15 }
 0x330   : > { %3177 = shalt.err (!%p3174_p2)
}
 0x331   : > { %s3178_s24 = scalar_lea.hbm %s3953_s14, 4096  ;;  %s3182_s28 = scalar_lea.hbm %s4007_s5, 8192 }
 0x332   : > { %p3179_p13 = scmp.ne.s32.totalorder %s3953_s14, %s3178_s24  ;;  %p3183_p4 = scmp.lt.u32.totalorder %s3953_s14, %s4007_s5 }
 0x333   : > { %p3184_p7 = scmp.lt.u32.totalorder %s3182_s28, %s3178_s24  ;;  %p3186_p11 = scmp.lt.u32.totalorder %s3178_s24, %s3953_s14 }
 0x334   : > { %p3180_p6 = pnand %p3179_p13, %p4023_p0 }
 0x335   : > { %p3185_p8 = por %p3184_p7, %p3183_p4 }
 0x336   : > { %p3181_p10 = pneg %p3180_p6 }
 0x337   : > { %p3187_p1 = por %p3186_p11, %p3185_p8 }
 0x339   : > { %p3188_p3 = pnand %p3187_p1, %p3181_p10 }
 0x33b   : > { %3191 = shalt.err (!%p3188_p3)
}
 0x33c   : > { %s3246_s29 = smov 128   ;;  %s3247_s9 = smov 8  }
 0x33d   : > { %2677 = dma.vmem_to_hbm [thread:$0]  (%p4023_p0), %s3955_s8, 4096, %s3953_s14, %s2123_s22, %s3246_s29, %s3246_s29, %s3247_s9  }
 0x33e PF: > { %s2151_s11 = sand.u32 1, %s3222_s18   ;;  %p4024_p5 = scmp.ne.s32.totalorder %s4012_s25, 0 }
 0x33f   : > { %p4025_p9 = scmp.ge.s32.totalorder %s3234_s21, 2  ;;  %s2152_s15 = scalar_lea.sflag [#allocation4], %s2151_s11 }
 0x341   : > { %p2691_p12 = pnand %p4025_p9, %p4024_p5 }
 0x343   : > { %3217 = dma.done.wait (!%p2691_p12), %s2152_s15, 4096  }
 0x344   : > { %3219 = vsyncadd (!%p2691_p12), %s2152_s15, 4294963200  ;;  %p19_p2 = scmp.ge.s32.totalorder %s3388_s16, 4   ;;  %s4026_s18 = smov %s3226_s19 }
 0x345   : > { %s4027_s19 = smov %s3230_s20  ;;  %s4028_s20 = smov %s3397_s27 }
 0x346   : > { %s4029_s21 = smov %s3388_s16  ;;  %21 = sbr.rel (!%p19_p2) target bundleno = 6 (0x6), region = 93 }
 0x34d   :  { %2157 = vsyncpa [#allocation3], 1 }
 0x34e   :  { %2159 = vsyncpa [#allocation3 + $0x1], 1 }
 0x34f   :  { %2160 = vsyncpa [#allocation6], 1 }
 0x350   :  { %2161 = vsyncpa [#allocation4], 1 }
 0x351   :  { %2163 = vsyncpa [#allocation4 + $0x1], 1 }

</bundles_post_ra>
